<compile_context>
chip_gen: v7x
topology: tpu7x:2x2x1
jax: 0.10.0
libtpu: 0.0.40
codegen_flags: <defaults>
</compile_context>

<pallas_src>
import math
from typing import Dict, List, Optional, Tuple

import jax
import jax.numpy as jnp
from jax.experimental import pallas as pl
from jax.experimental.pallas import tpu as pltpu

# An "Irreps" here is a list of (multiplicity, ir_dim) pairs, ir_dim = 2l+1.
Irreps = List[Tuple[int, int]]

_MIN_PALLAS_BYTES = 1 << 20        # below this, fused jnp beats a pallas launch
_SPLIT_MIN_BYTES = 2 << 20         # only split a single-tile grid above this
_MAX_PIECES = 4096                 # cap on statically-unrolled copy pieces
_LANE = 128


# ----------------------------------------------------------------------------
# Static layout analysis (pure Python, trace-time only).
# ----------------------------------------------------------------------------
def _irrep_chunks(irreps_head: Irreps, num_heads: int):
    """(input_offset, width) per irrep in the interleaved input layout."""
    chunks, start = [], 0
    for mul, ir_dim in irreps_head:
        w = mul * ir_dim
        chunks.append((start, w))
        start += num_heads * w
    head_dim = sum(mul * ir_dim for mul, ir_dim in irreps_head)
    return chunks, start, head_dim


def _row_copies(chunks, num_heads: int):
    """(in_off, out_off, width) list in output order for one row."""
    raw, out_off = [], 0
    for h in range(num_heads):
        for in_base, w in chunks:
            raw.append((in_base + h * w, out_off, w))
            out_off += w
    return raw


def _coalesce(copies):
    """Merge segments contiguous in BOTH input and output."""
    out: List[Tuple[int, int, int]] = []
    for i, o, w in copies:
        if out:
            pi, po, pw = out[-1]
            if pi + pw == i and po + pw == o:
                out[-1] = (pi, po, pw + w)
                continue
        out.append((i, o, w))
    return out


def _fold_copies(copies, d: int, fold: int):
    """Replicate the per-row copy list over `fold` rows folded into lanes."""
    out = []
    for r in range(fold):
        base = r * d
        out.extend((i + base, o + base, w) for i, o, w in copies)
    return _coalesce(out)


def _group_by_lane_window(copies, width: int, lane: int = _LANE):
    """Split copies at 128-lane *output* boundaries.

    Returns, per output window g (columns [g*128, (g+1)*128)), the ordered list
    of (input_offset, width) pieces whose concatenation fills the window.
    `copies` must tile [0, width) contiguously in output order (true by
    construction) and width must be a multiple of 128 (guaranteed by the fold).
    """
    assert width % lane == 0
    groups: List[List[Tuple[int, int]]] = [[] for _ in range(width // lane)]
    for i, o, w in copies:
        while w > 0:
            g = o // lane
            take = min(w, (g + 1) * lane - o)
            groups[g].append((i, take))
            i += take
            o += take
            w -= take
    return groups


# ----------------------------------------------------------------------------
# Kernel body: per 128-lane output window, assemble in registers, one store.
# ----------------------------------------------------------------------------
def _make_permute_kernel(groups, lane: int = _LANE):
    def kernel(x_ref, o_ref):
        for g, pieces in enumerate(groups):
            lo = g * lane
            if len(pieces) == 1:
                i0, w0 = pieces[0]
                o_ref[:, lo:lo + lane] = x_ref[:, i0:i0 + w0]
            else:
                o_ref[:, lo:lo + lane] = jnp.concatenate(
                    [x_ref[:, i0:i0 + w0] for i0, w0 in pieces], axis=-1)
    return kernel


# ----------------------------------------------------------------------------
# Generation-aware sizing.
# ----------------------------------------------------------------------------
def _vmem_capacity_bytes() -> int:
    try:
        info = pltpu.get_tpu_info()
        cap = getattr(info, "vmem_capacity_bytes", None)
        if cap:
            return int(cap)
    except Exception:
        pass
    return 64 << 20  # conservative default (v7x per-TC VMEM)


def _choose_row_tiling(n_rows: int, row_bytes: int, sub_min: int,
                       tile_target: int) -> Tuple[int, int]:
    """Pick (tile_rows, grid0). Prefers exact divisors (no ragged edge) and an
    even grid (keeps both v7x TensorCores busy); falls back to cdiv with a
    masked partial last block."""
    total_bytes = n_rows * row_bytes
    target_rows = max(sub_min, tile_target // max(1, row_bytes))

    if n_rows <= target_rows:
        # One block fits in VMEM. Split in two (even grid) only when the data
        # is big enough that the extra ~0.35us grid step is negligible on
        # single-TC v5e/v6e while buying ~2x on 2-TC v7x.
        if total_bytes >= _SPLIT_MIN_BYTES and n_rows % (2 * sub_min) == 0:
            return n_rows // 2, 2
        return n_rows, 1

    tn_base = max(sub_min, (target_rows // sub_min) * sub_min)
    best: Optional[Tuple[int, int]] = None
    t = tn_base
    for _ in range(64):                      # bounded divisor search
        if t < sub_min:
            break
        if n_rows % t == 0:
            g = n_rows // t
            if best is None:
                best = (t, g)
            if g % 2 == 0:
                return t, g
        t -= sub_min
    if best is not None:
        return best
    # No good divisor: ragged last block (Pallas drops OOB writes, OOB reads
    # are unspecified -- harmless for a pure row permutation).
    return tn_base, pl.cdiv(n_rows, tn_base)


# ----------------------------------------------------------------------------
# The Pallas path (lane-dense, full-width stores).
# ----------------------------------------------------------------------------
def _permute_pallas(xb: jax.Array, base_copies, d: int, fold: int,
                    num_heads: int, head_dim: int) -> Optional[jax.Array]:
    """Apply the permutation to xb ([Nb, d], Nb % fold == 0) via Pallas.
    Returns None if the static-unroll / VMEM guards trip (caller falls back)."""
    nb = xb.shape[0]
    width = fold * d
    n_rows = nb // fold
    itemsize = jnp.dtype(xb.dtype).itemsize

    copies = _fold_copies(base_copies, d, fold)
    groups = _group_by_lane_window(copies, width)
    if sum(len(g) for g in groups) > _MAX_PIECES:
        return None  # pathological fold x irreps combination; caller uses jnp

    vmem_cap = _vmem_capacity_bytes()
    if vmem_cap >= (96 << 20):               # v5e / v6e class (128 MiB VMEM)
        tile_target, vmem_limit = 12 << 20, 64 << 20
    else:                                     # v7x class (64 MiB per-TC VMEM)
        tile_target, vmem_limit = 8 << 20, 40 << 20

    sub_min = {4: 8, 2: 16, 1: 32}.get(itemsize, 8)
    tn, grid0 = _choose_row_tiling(n_rows, width * itemsize, sub_min, tile_target)

    # Guard: double-buffered in+out (~4 live blocks) must fit the scoped limit
    # even for extremely wide rows.
    need = 4 * tn * width * itemsize + (2 << 20)
    if need > vmem_limit:
        budget = max(vmem_cap - (16 << 20), 0)
        if need <= budget:
            vmem_limit = need
        else:
            return None

    x2d = xb.reshape(n_rows, width)           # free row-major reshape
    kernel = _make_permute_kernel(groups)

    out2d = pl.pallas_call(
        kernel,
        out_shape=jax.ShapeDtypeStruct((n_rows, width), xb.dtype),
        grid=(grid0,),
        in_specs=[pl.BlockSpec((tn, width), lambda i: (i, 0))],
        out_specs=pl.BlockSpec((tn, width), lambda i: (i, 0)),
        compiler_params=pltpu.CompilerParams(
            dimension_semantics=("parallel",),
            vmem_limit_bytes=int(vmem_limit)),
    )(x2d)

    return out2d.reshape(nb, num_heads, head_dim)


# ----------------------------------------------------------------------------
# Pure-jnp formulation (spec reference + small-input fast path).
# ----------------------------------------------------------------------------
def _vec2heads_jnp(x: jax.Array, irreps_head: Irreps, num_heads: int) -> jax.Array:
    n = x.shape[0]
    parts, off = [], 0
    for mul, ir_dim in irreps_head:
        w = mul * ir_dim
        parts.append(x[:, off: off + num_heads * w].reshape(n, num_heads, w))
        off += num_heads * w
    return jnp.concatenate(parts, axis=2)


# ----------------------------------------------------------------------------
# Public entry point for one key.
# ----------------------------------------------------------------------------
def vec2attnheads(x: jax.Array, irreps_head: Irreps, num_heads: int, *,
                  min_pallas_bytes: int = _MIN_PALLAS_BYTES) -> jax.Array:
    """[N, num_heads*head_dim] -> [N, num_heads, head_dim] for one key."""
    n, d = x.shape
    chunks, d_in, head_dim = _irrep_chunks(irreps_head, num_heads)
    if d != d_in:
        raise ValueError(f"feature dim {d} != expected {d_in}")

    base_copies = _coalesce(_row_copies(chunks, num_heads))

    # Identity permutation (single irrep, or num_heads == 1): pure reshape,
    # no kernel, no HBM round trip.
    if len(base_copies) == 1:
        return x.reshape(n, num_heads, head_dim)

    itemsize = jnp.dtype(x.dtype).itemsize

    # Small-input fast path: per-key pallas launch overhead dominates; let XLA
    # fuse the (tiny) slice/reshape/concat instead.
    if n * d * itemsize < min_pallas_bytes or n == 0:
        return _vec2heads_jnp(x, irreps_head, num_heads)

    # Lane-dense fold: D == d_out (pure permutation), so fold f rows into the
    # lane axis so the folded row width is a multiple of 128 (unmasked stores).
    fold = 1 if d % _LANE == 0 else _LANE // math.gcd(d, _LANE)
    if n < fold:
        return _vec2heads_jnp(x, irreps_head, num_heads)

    n_bulk = (n // fold) * fold
    xb = x if n_bulk == n else x[:n_bulk]
    out_bulk = _permute_pallas(xb, base_copies, d, fold, num_heads, head_dim)
    if out_bulk is None:
        # TODO(synk): unroll/VMEM guard tripped (huge fold x many irreps or an
        # extremely wide row); fall back to the XLA formulation.
        return _vec2heads_jnp(x, irreps_head, num_heads)

    if n_bulk == n:
        return out_bulk

    # Ragged fold: keep the bulk on the folded, unmasked-store path; only the
    # < fold leftover rows go through jnp. (The axis-0 concat still costs one
    # extra pass over the bulk output -- the real fix is consumer fusion.)
    out_rem = _vec2heads_jnp(x[n_bulk:], irreps_head, num_heads)
    return jnp.concatenate([out_bulk, out_rem], axis=0)


class Vec2AttnHeadsModuleDictPallas:
    """JAX/Pallas port of Vec2AttnHeadsModuleDict (no learnable parameters)."""

    def __init__(self, irreps_head_dict: Dict[str, Irreps], num_head: int, *,
                 min_pallas_bytes: int = _MIN_PALLAS_BYTES):
        self.irreps_head_dict = irreps_head_dict
        self.num_head = num_head
        self.min_pallas_bytes = min_pallas_bytes

    def __call__(self, x_dict: Dict[str, jax.Array]) -> Dict[str, jax.Array]:
        # TODO(synk): when the upstream produces all keys as one contiguous
        # slab, fuse every key into a single pallas_call (one lane-dense slab)
        # to amortize launch overhead; with separate per-key arrays the
        # wrapper-side concat would cost an extra HBM pass, so keep per-key.
        return {
            k: vec2attnheads(v, self.irreps_head_dict[k], self.num_head,
                             min_pallas_bytes=self.min_pallas_bytes)
            for k, v in x_dict.items()
        }


if __name__ == "__main__":
    num_head = 4
    irreps_head_dict: Dict[str, Irreps] = {
        "a": [(4, 1), (2, 3)],   # head_dim 10 -> real permutation, fold=16
        "b": [(8, 1)],           # head_dim 8  -> identity, reshape-only path
        "c": [(2, 1), (1, 3)],   # head_dim 5  -> real permutation, fold=32
        "d": [(4, 1), (2, 3)],   # head_dim 10 -> ragged-N fold (bulk + jnp rem)
    }
    feat_dim = {k: num_head * sum(m * i for m, i in v)
                for k, v in irreps_head_dict.items()}
    rows = {"a": 256, "b": 64, "c": 256, "d": 250}

    root = jax.random.PRNGKey(0)
    subkeys = jax.random.split(root, len(irreps_head_dict))
    names = sorted(irreps_head_dict)
    x_dict = {
        name: jax.random.normal(sk, (rows[name], feat_dim[name]), dtype=jnp.float32)
        for sk, name in zip(subkeys, names)
    }

    # Pure-JAX reference (matches the PyTorch Vec2AttnHeads forward).
    ref_dict = {k: _vec2heads_jnp(v, irreps_head_dict[k], num_head)
                for k, v in x_dict.items()}

    # Default module: these small inputs take the identity / fused-jnp paths.
    module_default = Vec2AttnHeadsModuleDictPallas(irreps_head_dict, num_head)
    out_default = module_default(x_dict)

    # Force the Pallas path (threshold 0) so the kernel itself is exercised.
    module_pallas = Vec2AttnHeadsModuleDictPallas(irreps_head_dict, num_head,
                                                  min_pallas_bytes=0)
    out_pallas = module_pallas(x_dict)

    out_default = jax.tree_util.tree_map(jax.block_until_ready, out_default)
    out_pallas = jax.tree_util.tree_map(jax.block_until_ready, out_pallas)

    for k in x_dict:
        for tag, out in (("default", out_default), ("pallas", out_pallas)):
            assert out[k].shape == ref_dict[k].shape, (tag, k, out[k].shape)
            assert jnp.allclose(out[k], ref_dict[k]), f"mismatch ({tag}) key {k}"

    print("KERNEL_OK")
</pallas_src>

<mosaic_0001>
module attributes {stable_mosaic.version = 11 : i64} {
  func.func @kernel(%arg0: i32, %arg1: memref<16x640xf32, #tpu.memory_space<vmem>>, %arg2: memref<16x640xf32, #tpu.memory_space<vmem>>) attributes {dimension_semantics = [#tpu.dimension_semantics<parallel>], iteration_bounds = array<i64: 1>, scalar_prefetch = 0 : i64, scratch_operands = 0 : i64, tpu.core_type = #tpu.core_type<tc>, window_params = [{transform_indices = @transform_0, window_bounds = array<i64: 16, 640>}, {transform_indices = @transform_1, window_bounds = array<i64: 16, 640>}]} {
    %c0 = arith.constant 0 : index
    %c0_0 = arith.constant 0 : index
    %0 = vector.load %arg1[%c0, %c0_0] : memref<16x640xf32, #tpu.memory_space<vmem>>, vector<16x4xf32>
    %c0_1 = arith.constant 0 : index
    %c16 = arith.constant 16 : index
    %1 = vector.load %arg1[%c0_1, %c16] : memref<16x640xf32, #tpu.memory_space<vmem>>, vector<16x6xf32>
    %c0_2 = arith.constant 0 : index
    %c4 = arith.constant 4 : index
    %2 = vector.load %arg1[%c0_2, %c4] : memref<16x640xf32, #tpu.memory_space<vmem>>, vector<16x4xf32>
    %c0_3 = arith.constant 0 : index
    %c22 = arith.constant 22 : index
    %3 = vector.load %arg1[%c0_3, %c22] : memref<16x640xf32, #tpu.memory_space<vmem>>, vector<16x6xf32>
    %c0_4 = arith.constant 0 : index
    %c8 = arith.constant 8 : index
    %4 = vector.load %arg1[%c0_4, %c8] : memref<16x640xf32, #tpu.memory_space<vmem>>, vector<16x4xf32>
    %c0_5 = arith.constant 0 : index
    %c28 = arith.constant 28 : index
    %5 = vector.load %arg1[%c0_5, %c28] : memref<16x640xf32, #tpu.memory_space<vmem>>, vector<16x6xf32>
    %c0_6 = arith.constant 0 : index
    %c12 = arith.constant 12 : index
    %6 = vector.load %arg1[%c0_6, %c12] : memref<16x640xf32, #tpu.memory_space<vmem>>, vector<16x4xf32>
    %c0_7 = arith.constant 0 : index
    %c34 = arith.constant 34 : index
    %7 = vector.load %arg1[%c0_7, %c34] : memref<16x640xf32, #tpu.memory_space<vmem>>, vector<16x10xf32>
    %c0_8 = arith.constant 0 : index
    %c56 = arith.constant 56 : index
    %8 = vector.load %arg1[%c0_8, %c56] : memref<16x640xf32, #tpu.memory_space<vmem>>, vector<16x6xf32>
    %c0_9 = arith.constant 0 : index
    %c44 = arith.constant 44 : index
    %9 = vector.load %arg1[%c0_9, %c44] : memref<16x640xf32, #tpu.memory_space<vmem>>, vector<16x4xf32>
    %c0_10 = arith.constant 0 : index
    %c62 = arith.constant 62 : index
    %10 = vector.load %arg1[%c0_10, %c62] : memref<16x640xf32, #tpu.memory_space<vmem>>, vector<16x6xf32>
    %c0_11 = arith.constant 0 : index
    %c48 = arith.constant 48 : index
    %11 = vector.load %arg1[%c0_11, %c48] : memref<16x640xf32, #tpu.memory_space<vmem>>, vector<16x4xf32>
    %c0_12 = arith.constant 0 : index
    %c68 = arith.constant 68 : index
    %12 = vector.load %arg1[%c0_12, %c68] : memref<16x640xf32, #tpu.memory_space<vmem>>, vector<16x6xf32>
    %c0_13 = arith.constant 0 : index
    %c52 = arith.constant 52 : index
    %13 = vector.load %arg1[%c0_13, %c52] : memref<16x640xf32, #tpu.memory_space<vmem>>, vector<16x4xf32>
    %c0_14 = arith.constant 0 : index
    %c74 = arith.constant 74 : index
    %14 = vector.load %arg1[%c0_14, %c74] : memref<16x640xf32, #tpu.memory_space<vmem>>, vector<16x10xf32>
    %c0_15 = arith.constant 0 : index
    %c96 = arith.constant 96 : index
    %15 = vector.load %arg1[%c0_15, %c96] : memref<16x640xf32, #tpu.memory_space<vmem>>, vector<16x6xf32>
    %c0_16 = arith.constant 0 : index
    %c84 = arith.constant 84 : index
    %16 = vector.load %arg1[%c0_16, %c84] : memref<16x640xf32, #tpu.memory_space<vmem>>, vector<16x4xf32>
    %c0_17 = arith.constant 0 : index
    %c102 = arith.constant 102 : index
    %17 = vector.load %arg1[%c0_17, %c102] : memref<16x640xf32, #tpu.memory_space<vmem>>, vector<16x6xf32>
    %c0_18 = arith.constant 0 : index
    %c88 = arith.constant 88 : index
    %18 = vector.load %arg1[%c0_18, %c88] : memref<16x640xf32, #tpu.memory_space<vmem>>, vector<16x4xf32>
    %c0_19 = arith.constant 0 : index
    %c108 = arith.constant 108 : index
    %19 = vector.load %arg1[%c0_19, %c108] : memref<16x640xf32, #tpu.memory_space<vmem>>, vector<16x6xf32>
    %c0_20 = arith.constant 0 : index
    %c92 = arith.constant 92 : index
    %20 = vector.load %arg1[%c0_20, %c92] : memref<16x640xf32, #tpu.memory_space<vmem>>, vector<16x4xf32>
    %c0_21 = arith.constant 0 : index
    %c114 = arith.constant 114 : index
    %21 = vector.load %arg1[%c0_21, %c114] : memref<16x640xf32, #tpu.memory_space<vmem>>, vector<16x10xf32>
    %c0_22 = arith.constant 0 : index
    %c136 = arith.constant 136 : index
    %22 = vector.load %arg1[%c0_22, %c136] : memref<16x640xf32, #tpu.memory_space<vmem>>, vector<16x4xf32>
    %23 = tpu.concatenate %0, %1, %2, %3, %4, %5, %6, %7, %8, %9, %10, %11, %12, %13, %14, %15 in 1 : vector<16x4xf32>, vector<16x6xf32>, vector<16x4xf32>, vector<16x6xf32>, vector<16x4xf32>, vector<16x6xf32>, vector<16x4xf32>, vector<16x10xf32>, vector<16x6xf32>, vector<16x4xf32>, vector<16x6xf32>, vector<16x4xf32>, vector<16x6xf32>, vector<16x4xf32>, vector<16x10xf32>, vector<16x6xf32> -> vector<16x90xf32>
    %24 = tpu.concatenate %16, %17, %18, %19, %20, %21, %22 in 1 : vector<16x4xf32>, vector<16x6xf32>, vector<16x4xf32>, vector<16x6xf32>, vector<16x4xf32>, vector<16x10xf32>, vector<16x4xf32> -> vector<16x38xf32>
    %25 = tpu.concatenate %23, %24 in 1 : vector<16x90xf32>, vector<16x38xf32> -> vector<16x128xf32>
    %c0_23 = arith.constant 0 : index
    %c0_24 = arith.constant 0 : index
    %26 = vector.load %arg2[%c0_23, %c0_24] : memref<16x640xf32, #tpu.memory_space<vmem>>, vector<16x128xf32>
    tpu.vector_store %arg2[%c0_23, %c0_24], %25 {strides = array<i32>} : memref<16x640xf32, #tpu.memory_space<vmem>>, vector<16x128xf32>,
    %c0_25 = arith.constant 0 : index
    %c140 = arith.constant 140 : index
    %27 = vector.load %arg1[%c0_25, %c140] : memref<16x640xf32, #tpu.memory_space<vmem>>, vector<16x2xf32>
    %c0_26 = arith.constant 0 : index
    %c124 = arith.constant 124 : index
    %28 = vector.load %arg1[%c0_26, %c124] : memref<16x640xf32, #tpu.memory_space<vmem>>, vector<16x4xf32>
    %c0_27 = arith.constant 0 : index
    %c142 = arith.constant 142 : index
    %29 = vector.load %arg1[%c0_27, %c142] : memref<16x640xf32, #tpu.memory_space<vmem>>, vector<16x6xf32>
    %c0_28 = arith.constant 0 : index
    %c128 = arith.constant 128 : index
    %30 = vector.load %arg1[%c0_28, %c128] : memref<16x640xf32, #tpu.memory_space<vmem>>, vector<16x4xf32>
    %c0_29 = arith.constant 0 : index
    %c148 = arith.constant 148 : index
    %31 = vector.load %arg1[%c0_29, %c148] : memref<16x640xf32, #tpu.memory_space<vmem>>, vector<16x6xf32>
    %c0_30 = arith.constant 0 : index
    %c132 = arith.constant 132 : index
    %32 = vector.load %arg1[%c0_30, %c132] : memref<16x640xf32, #tpu.memory_space<vmem>>, vector<16x4xf32>
    %c0_31 = arith.constant 0 : index
    %c154 = arith.constant 154 : index
    %33 = vector.load %arg1[%c0_31, %c154] : memref<16x640xf32, #tpu.memory_space<vmem>>, vector<16x10xf32>
    %c0_32 = arith.constant 0 : index
    %c176 = arith.constant 176 : index
    %34 = vector.load %arg1[%c0_32, %c176] : memref<16x640xf32, #tpu.memory_space<vmem>>, vector<16x6xf32>
    %c0_33 = arith.constant 0 : index
    %c164 = arith.constant 164 : index
    %35 = vector.load %arg1[%c0_33, %c164] : memref<16x640xf32, #tpu.memory_space<vmem>>, vector<16x4xf32>
    %c0_34 = arith.constant 0 : index
    %c182 = arith.constant 182 : index
    %36 = vector.load %arg1[%c0_34, %c182] : memref<16x640xf32, #tpu.memory_space<vmem>>, vector<16x6xf32>
    %c0_35 = arith.constant 0 : index
    %c168 = arith.constant 168 : index
    %37 = vector.load %arg1[%c0_35, %c168] : memref<16x640xf32, #tpu.memory_space<vmem>>, vector<16x4xf32>
    %c0_36 = arith.constant 0 : index
    %c188 = arith.constant 188 : index
    %38 = vector.load %arg1[%c0_36, %c188] : memref<16x640xf32, #tpu.memory_space<vmem>>, vector<16x6xf32>
    %c0_37 = arith.constant 0 : index
    %c172 = arith.constant 172 : index
    %39 = vector.load %arg1[%c0_37, %c172] : memref<16x640xf32, #tpu.memory_space<vmem>>, vector<16x4xf32>
    %c0_38 = arith.constant 0 : index
    %c194 = arith.constant 194 : index
    %40 = vector.load %arg1[%c0_38, %c194] : memref<16x640xf32, #tpu.memory_space<vmem>>, vector<16x10xf32>
    %c0_39 = arith.constant 0 : index
    %c216 = arith.constant 216 : index
    %41 = vector.load %arg1[%c0_39, %c216] : memref<16x640xf32, #tpu.memory_space<vmem>>, vector<16x6xf32>
    %c0_40 = arith.constant 0 : index
    %c204 = arith.constant 204 : index
    %42 = vector.load %arg1[%c0_40, %c204] : memref<16x640xf32, #tpu.memory_space<vmem>>, vector<16x4xf32>
    %c0_41 = arith.constant 0 : index
    %c222 = arith.constant 222 : index
    %43 = vector.load %arg1[%c0_41, %c222] : memref<16x640xf32, #tpu.memory_space<vmem>>, vector<16x6xf32>
    %c0_42 = arith.constant 0 : index
    %c208 = arith.constant 208 : index
    %44 = vector.load %arg1[%c0_42, %c208] : memref<16x640xf32, #tpu.memory_space<vmem>>, vector<16x4xf32>
    %c0_43 = arith.constant 0 : index
    %c228 = arith.constant 228 : index
    %45 = vector.load %arg1[%c0_43, %c228] : memref<16x640xf32, #tpu.memory_space<vmem>>, vector<16x6xf32>
    %c0_44 = arith.constant 0 : index
    %c212 = arith.constant 212 : index
    %46 = vector.load %arg1[%c0_44, %c212] : memref<16x640xf32, #tpu.memory_space<vmem>>, vector<16x4xf32>
    %c0_45 = arith.constant 0 : index
    %c234 = arith.constant 234 : index
    %47 = vector.load %arg1[%c0_45, %c234] : memref<16x640xf32, #tpu.memory_space<vmem>>, vector<16x10xf32>
    %c0_46 = arith.constant 0 : index
    %c256 = arith.constant 256 : index
    %48 = vector.load %arg1[%c0_46, %c256] : memref<16x640xf32, #tpu.memory_space<vmem>>, vector<16x6xf32>
    %c0_47 = arith.constant 0 : index
    %c244 = arith.constant 244 : index
    %49 = vector.load %arg1[%c0_47, %c244] : memref<16x640xf32, #tpu.memory_space<vmem>>, vector<16x4xf32>
    %c0_48 = arith.constant 0 : index
    %c262 = arith.constant 262 : index
    %50 = vector.load %arg1[%c0_48, %c262] : memref<16x640xf32, #tpu.memory_space<vmem>>, vector<16x2xf32>
    %51 = tpu.concatenate %27, %28, %29, %30, %31, %32, %33, %34, %35, %36, %37, %38, %39, %40, %41, %42 in 1 : vector<16x2xf32>, vector<16x4xf32>, vector<16x6xf32>, vector<16x4xf32>, vector<16x6xf32>, vector<16x4xf32>, vector<16x10xf32>, vector<16x6xf32>, vector<16x4xf32>, vector<16x6xf32>, vector<16x4xf32>, vector<16x6xf32>, vector<16x4xf32>, vector<16x10xf32>, vector<16x6xf32>, vector<16x4xf32> -> vector<16x86xf32>
    %52 = tpu.concatenate %43, %44, %45, %46, %47, %48, %49, %50 in 1 : vector<16x6xf32>, vector<16x4xf32>, vector<16x6xf32>, vector<16x4xf32>, vector<16x10xf32>, vector<16x6xf32>, vector<16x4xf32>, vector<16x2xf32> -> vector<16x42xf32>
    %53 = tpu.concatenate %51, %52 in 1 : vector<16x86xf32>, vector<16x42xf32> -> vector<16x128xf32>
    %c0_49 = arith.constant 0 : index
    %c128_50 = arith.constant 128 : index
    %54 = vector.load %arg2[%c0_49, %c128_50] : memref<16x640xf32, #tpu.memory_space<vmem>>, vector<16x128xf32>
    tpu.vector_store %arg2[%c0_49, %c128_50], %53 {strides = array<i32>} : memref<16x640xf32, #tpu.memory_space<vmem>>, vector<16x128xf32>,
    %c0_51 = arith.constant 0 : index
    %c264 = arith.constant 264 : index
    %55 = vector.load %arg1[%c0_51, %c264] : memref<16x640xf32, #tpu.memory_space<vmem>>, vector<16x4xf32>
    %c0_52 = arith.constant 0 : index
    %c248 = arith.constant 248 : index
    %56 = vector.load %arg1[%c0_52, %c248] : memref<16x640xf32, #tpu.memory_space<vmem>>, vector<16x4xf32>
    %c0_53 = arith.constant 0 : index
    %c268 = arith.constant 268 : index
    %57 = vector.load %arg1[%c0_53, %c268] : memref<16x640xf32, #tpu.memory_space<vmem>>, vector<16x6xf32>
    %c0_54 = arith.constant 0 : index
    %c252 = arith.constant 252 : index
    %58 = vector.load %arg1[%c0_54, %c252] : memref<16x640xf32, #tpu.memory_space<vmem>>, vector<16x4xf32>
    %c0_55 = arith.constant 0 : index
    %c274 = arith.constant 274 : index
    %59 = vector.load %arg1[%c0_55, %c274] : memref<16x640xf32, #tpu.memory_space<vmem>>, vector<16x10xf32>
    %c0_56 = arith.constant 0 : index
    %c296 = arith.constant 296 : index
    %60 = vector.load %arg1[%c0_56, %c296] : memref<16x640xf32, #tpu.memory_space<vmem>>, vector<16x6xf32>
    %c0_57 = arith.constant 0 : index
    %c284 = arith.constant 284 : index
    %61 = vector.load %arg1[%c0_57, %c284] : memref<16x640xf32, #tpu.memory_space<vmem>>, vector<16x4xf32>
    %c0_58 = arith.constant 0 : index
    %c302 = arith.constant 302 : index
    %62 = vector.load %arg1[%c0_58, %c302] : memref<16x640xf32, #tpu.memory_space<vmem>>, vector<16x6xf32>
    %c0_59 = arith.constant 0 : index
    %c288 = arith.constant 288 : index
    %63 = vector.load %arg1[%c0_59, %c288] : memref<16x640xf32, #tpu.memory_space<vmem>>, vector<16x4xf32>
    %c0_60 = arith.constant 0 : index
    %c308 = arith.constant 308 : index
    %64 = vector.load %arg1[%c0_60, %c308] : memref<16x640xf32, #tpu.memory_space<vmem>>, vector<16x6xf32>
    %c0_61 = arith.constant 0 : index
    %c292 = arith.constant 292 : index
    %65 = vector.load %arg1[%c0_61, %c292] : memref<16x640xf32, #tpu.memory_space<vmem>>, vector<16x4xf32>
    %c0_62 = arith.constant 0 : index
    %c314 = arith.constant 314 : index
    %66 = vector.load %arg1[%c0_62, %c314] : memref<16x640xf32, #tpu.memory_space<vmem>>, vector<16x10xf32>
    %c0_63 = arith.constant 0 : index
    %c336 = arith.constant 336 : index
    %67 = vector.load %arg1[%c0_63, %c336] : memref<16x640xf32, #tpu.memory_space<vmem>>, vector<16x6xf32>
    %c0_64 = arith.constant 0 : index
    %c324 = arith.constant 324 : index
    %68 = vector.load %arg1[%c0_64, %c324] : memref<16x640xf32, #tpu.memory_space<vmem>>, vector<16x4xf32>
    %c0_65 = arith.constant 0 : index
    %c342 = arith.constant 342 : index
    %69 = vector.load %arg1[%c0_65, %c342] : memref<16x640xf32, #tpu.memory_space<vmem>>, vector<16x6xf32>
    %c0_66 = arith.constant 0 : index
    %c328 = arith.constant 328 : index
    %70 = vector.load %arg1[%c0_66, %c328] : memref<16x640xf32, #tpu.memory_space<vmem>>, vector<16x4xf32>
    %c0_67 = arith.constant 0 : index
    %c348 = arith.constant 348 : index
    %71 = vector.load %arg1[%c0_67, %c348] : memref<16x640xf32, #tpu.memory_space<vmem>>, vector<16x6xf32>
    %c0_68 = arith.constant 0 : index
    %c332 = arith.constant 332 : index
    %72 = vector.load %arg1[%c0_68, %c332] : memref<16x640xf32, #tpu.memory_space<vmem>>, vector<16x4xf32>
    %c0_69 = arith.constant 0 : index
    %c354 = arith.constant 354 : index
    %73 = vector.load %arg1[%c0_69, %c354] : memref<16x640xf32, #tpu.memory_space<vmem>>, vector<16x10xf32>
    %c0_70 = arith.constant 0 : index
    %c376 = arith.constant 376 : index
    %74 = vector.load %arg1[%c0_70, %c376] : memref<16x640xf32, #tpu.memory_space<vmem>>, vector<16x6xf32>
    %c0_71 = arith.constant 0 : index
    %c364 = arith.constant 364 : index
    %75 = vector.load %arg1[%c0_71, %c364] : memref<16x640xf32, #tpu.memory_space<vmem>>, vector<16x4xf32>
    %c0_72 = arith.constant 0 : index
    %c382 = arith.constant 382 : index
    %76 = vector.load %arg1[%c0_72, %c382] : memref<16x640xf32, #tpu.memory_space<vmem>>, vector<16x6xf32>
    %c0_73 = arith.constant 0 : index
    %c368 = arith.constant 368 : index
    %77 = vector.load %arg1[%c0_73, %c368] : memref<16x640xf32, #tpu.memory_space<vmem>>, vector<16x4xf32>
    %78 = tpu.concatenate %55, %56, %57, %58, %59, %60, %61, %62, %63, %64, %65, %66, %67, %68, %69, %70 in 1 : vector<16x4xf32>, vector<16x4xf32>, vector<16x6xf32>, vector<16x4xf32>, vector<16x10xf32>, vector<16x6xf32>, vector<16x4xf32>, vector<16x6xf32>, vector<16x4xf32>, vector<16x6xf32>, vector<16x4xf32>, vector<16x10xf32>, vector<16x6xf32>, vector<16x4xf32>, vector<16x6xf32>, vector<16x4xf32> -> vector<16x88xf32>
    %79 = tpu.concatenate %71, %72, %73, %74, %75, %76, %77 in 1 : vector<16x6xf32>, vector<16x4xf32>, vector<16x10xf32>, vector<16x6xf32>, vector<16x4xf32>, vector<16x6xf32>, vector<16x4xf32> -> vector<16x40xf32>
    %80 = tpu.concatenate %78, %79 in 1 : vector<16x88xf32>, vector<16x40xf32> -> vector<16x128xf32>
    %c0_74 = arith.constant 0 : index
    %c256_75 = arith.constant 256 : index
    %81 = vector.load %arg2[%c0_74, %c256_75] : memref<16x640xf32, #tpu.memory_space<vmem>>, vector<16x128xf32>
    tpu.vector_store %arg2[%c0_74, %c256_75], %80 {strides = array<i32>} : memref<16x640xf32, #tpu.memory_space<vmem>>, vector<16x128xf32>,
    %c0_76 = arith.constant 0 : index
    %c388 = arith.constant 388 : index
    %82 = vector.load %arg1[%c0_76, %c388] : memref<16x640xf32, #tpu.memory_space<vmem>>, vector<16x6xf32>
    %c0_77 = arith.constant 0 : index
    %c372 = arith.constant 372 : index
    %83 = vector.load %arg1[%c0_77, %c372] : memref<16x640xf32, #tpu.memory_space<vmem>>, vector<16x4xf32>
    %c0_78 = arith.constant 0 : index
    %c394 = arith.constant 394 : index
    %84 = vector.load %arg1[%c0_78, %c394] : memref<16x640xf32, #tpu.memory_space<vmem>>, vector<16x10xf32>
    %c0_79 = arith.constant 0 : index
    %c416 = arith.constant 416 : index
    %85 = vector.load %arg1[%c0_79, %c416] : memref<16x640xf32, #tpu.memory_space<vmem>>, vector<16x6xf32>
    %c0_80 = arith.constant 0 : index
    %c404 = arith.constant 404 : index
    %86 = vector.load %arg1[%c0_80, %c404] : memref<16x640xf32, #tpu.memory_space<vmem>>, vector<16x4xf32>
    %c0_81 = arith.constant 0 : index
    %c422 = arith.constant 422 : index
    %87 = vector.load %arg1[%c0_81, %c422] : memref<16x640xf32, #tpu.memory_space<vmem>>, vector<16x6xf32>
    %c0_82 = arith.constant 0 : index
    %c408 = arith.constant 408 : index
    %88 = vector.load %arg1[%c0_82, %c408] : memref<16x640xf32, #tpu.memory_space<vmem>>, vector<16x4xf32>
    %c0_83 = arith.constant 0 : index
    %c428 = arith.constant 428 : index
    %89 = vector.load %arg1[%c0_83, %c428] : memref<16x640xf32, #tpu.memory_space<vmem>>, vector<16x6xf32>
    %c0_84 = arith.constant 0 : index
    %c412 = arith.constant 412 : index
    %90 = vector.load %arg1[%c0_84, %c412] : memref<16x640xf32, #tpu.memory_space<vmem>>, vector<16x4xf32>
    %c0_85 = arith.constant 0 : index
    %c434 = arith.constant 434 : index
    %91 = vector.load %arg1[%c0_85, %c434] : memref<16x640xf32, #tpu.memory_space<vmem>>, vector<16x10xf32>
    %c0_86 = arith.constant 0 : index
    %c456 = arith.constant 456 : index
    %92 = vector.load %arg1[%c0_86, %c456] : memref<16x640xf32, #tpu.memory_space<vmem>>, vector<16x6xf32>
    %c0_87 = arith.constant 0 : index
    %c444 = arith.constant 444 : index
    %93 = vector.load %arg1[%c0_87, %c444] : memref<16x640xf32, #tpu.memory_space<vmem>>, vector<16x4xf32>
    %c0_88 = arith.constant 0 : index
    %c462 = arith.constant 462 : index
    %94 = vector.load %arg1[%c0_88, %c462] : memref<16x640xf32, #tpu.memory_space<vmem>>, vector<16x6xf32>
    %c0_89 = arith.constant 0 : index
    %c448 = arith.constant 448 : index
    %95 = vector.load %arg1[%c0_89, %c448] : memref<16x640xf32, #tpu.memory_space<vmem>>, vector<16x4xf32>
    %c0_90 = arith.constant 0 : index
    %c468 = arith.constant 468 : index
    %96 = vector.load %arg1[%c0_90, %c468] : memref<16x640xf32, #tpu.memory_space<vmem>>, vector<16x6xf32>
    %c0_91 = arith.constant 0 : index
    %c452 = arith.constant 452 : index
    %97 = vector.load %arg1[%c0_91, %c452] : memref<16x640xf32, #tpu.memory_space<vmem>>, vector<16x4xf32>
    %c0_92 = arith.constant 0 : index
    %c474 = arith.constant 474 : index
    %98 = vector.load %arg1[%c0_92, %c474] : memref<16x640xf32, #tpu.memory_space<vmem>>, vector<16x10xf32>
    %c0_93 = arith.constant 0 : index
    %c496 = arith.constant 496 : index
    %99 = vector.load %arg1[%c0_93, %c496] : memref<16x640xf32, #tpu.memory_space<vmem>>, vector<16x6xf32>
    %c0_94 = arith.constant 0 : index
    %c484 = arith.constant 484 : index
    %100 = vector.load %arg1[%c0_94, %c484] : memref<16x640xf32, #tpu.memory_space<vmem>>, vector<16x4xf32>
    %c0_95 = arith.constant 0 : index
    %c502 = arith.constant 502 : index
    %101 = vector.load %arg1[%c0_95, %c502] : memref<16x640xf32, #tpu.memory_space<vmem>>, vector<16x6xf32>
    %c0_96 = arith.constant 0 : index
    %c488 = arith.constant 488 : index
    %102 = vector.load %arg1[%c0_96, %c488] : memref<16x640xf32, #tpu.memory_space<vmem>>, vector<16x4xf32>
    %c0_97 = arith.constant 0 : index
    %c508 = arith.constant 508 : index
    %103 = vector.load %arg1[%c0_97, %c508] : memref<16x640xf32, #tpu.memory_space<vmem>>, vector<16x6xf32>
    %c0_98 = arith.constant 0 : index
    %c492 = arith.constant 492 : index
    %104 = vector.load %arg1[%c0_98, %c492] : memref<16x640xf32, #tpu.memory_space<vmem>>, vector<16x2xf32>
    %105 = tpu.concatenate %82, %83, %84, %85, %86, %87, %88, %89, %90, %91, %92, %93, %94, %95, %96, %97 in 1 : vector<16x6xf32>, vector<16x4xf32>, vector<16x10xf32>, vector<16x6xf32>, vector<16x4xf32>, vector<16x6xf32>, vector<16x4xf32>, vector<16x6xf32>, vector<16x4xf32>, vector<16x10xf32>, vector<16x6xf32>, vector<16x4xf32>, vector<16x6xf32>, vector<16x4xf32>, vector<16x6xf32>, vector<16x4xf32> -> vector<16x90xf32>
    %106 = tpu.concatenate %98, %99, %100, %101, %102, %103, %104 in 1 : vector<16x10xf32>, vector<16x6xf32>, vector<16x4xf32>, vector<16x6xf32>, vector<16x4xf32>, vector<16x6xf32>, vector<16x2xf32> -> vector<16x38xf32>
    %107 = tpu.concatenate %105, %106 in 1 : vector<16x90xf32>, vector<16x38xf32> -> vector<16x128xf32>
    %c0_99 = arith.constant 0 : index
    %c384 = arith.constant 384 : index
    %108 = vector.load %arg2[%c0_99, %c384] : memref<16x640xf32, #tpu.memory_space<vmem>>, vector<16x128xf32>
    tpu.vector_store %arg2[%c0_99, %c384], %107 {strides = array<i32>} : memref<16x640xf32, #tpu.memory_space<vmem>>, vector<16x128xf32>,
    %c0_100 = arith.constant 0 : index
    %c494 = arith.constant 494 : index
    %109 = vector.load %arg1[%c0_100, %c494] : memref<16x640xf32, #tpu.memory_space<vmem>>, vector<16x2xf32>
    %c0_101 = arith.constant 0 : index
    %c514 = arith.constant 514 : index
    %110 = vector.load %arg1[%c0_101, %c514] : memref<16x640xf32, #tpu.memory_space<vmem>>, vector<16x10xf32>
    %c0_102 = arith.constant 0 : index
    %c536 = arith.constant 536 : index
    %111 = vector.load %arg1[%c0_102, %c536] : memref<16x640xf32, #tpu.memory_space<vmem>>, vector<16x6xf32>
    %c0_103 = arith.constant 0 : index
    %c524 = arith.constant 524 : index
    %112 = vector.load %arg1[%c0_103, %c524] : memref<16x640xf32, #tpu.memory_space<vmem>>, vector<16x4xf32>
    %c0_104 = arith.constant 0 : index
    %c542 = arith.constant 542 : index
    %113 = vector.load %arg1[%c0_104, %c542] : memref<16x640xf32, #tpu.memory_space<vmem>>, vector<16x6xf32>
    %c0_105 = arith.constant 0 : index
    %c528 = arith.constant 528 : index
    %114 = vector.load %arg1[%c0_105, %c528] : memref<16x640xf32, #tpu.memory_space<vmem>>, vector<16x4xf32>
    %c0_106 = arith.constant 0 : index
    %c548 = arith.constant 548 : index
    %115 = vector.load %arg1[%c0_106, %c548] : memref<16x640xf32, #tpu.memory_space<vmem>>, vector<16x6xf32>
    %c0_107 = arith.constant 0 : index
    %c532 = arith.constant 532 : index
    %116 = vector.load %arg1[%c0_107, %c532] : memref<16x640xf32, #tpu.memory_space<vmem>>, vector<16x4xf32>
    %c0_108 = arith.constant 0 : index
    %c554 = arith.constant 554 : index
    %117 = vector.load %arg1[%c0_108, %c554] : memref<16x640xf32, #tpu.memory_space<vmem>>, vector<16x10xf32>
    %c0_109 = arith.constant 0 : index
    %c576 = arith.constant 576 : index
    %118 = vector.load %arg1[%c0_109, %c576] : memref<16x640xf32, #tpu.memory_space<vmem>>, vector<16x6xf32>
    %c0_110 = arith.constant 0 : index
    %c564 = arith.constant 564 : index
    %119 = vector.load %arg1[%c0_110, %c564] : memref<16x640xf32, #tpu.memory_space<vmem>>, vector<16x4xf32>
    %c0_111 = arith.constant 0 : index
    %c582 = arith.constant 582 : index
    %120 = vector.load %arg1[%c0_111, %c582] : memref<16x640xf32, #tpu.memory_space<vmem>>, vector<16x6xf32>
    %c0_112 = arith.constant 0 : index
    %c568 = arith.constant 568 : index
    %121 = vector.load %arg1[%c0_112, %c568] : memref<16x640xf32, #tpu.memory_space<vmem>>, vector<16x4xf32>
    %c0_113 = arith.constant 0 : index
    %c588 = arith.constant 588 : index
    %122 = vector.load %arg1[%c0_113, %c588] : memref<16x640xf32, #tpu.memory_space<vmem>>, vector<16x6xf32>
    %c0_114 = arith.constant 0 : index
    %c572 = arith.constant 572 : index
    %123 = vector.load %arg1[%c0_114, %c572] : memref<16x640xf32, #tpu.memory_space<vmem>>, vector<16x4xf32>
    %c0_115 = arith.constant 0 : index
    %c594 = arith.constant 594 : index
    %124 = vector.load %arg1[%c0_115, %c594] : memref<16x640xf32, #tpu.memory_space<vmem>>, vector<16x10xf32>
    %c0_116 = arith.constant 0 : index
    %c616 = arith.constant 616 : index
    %125 = vector.load %arg1[%c0_116, %c616] : memref<16x640xf32, #tpu.memory_space<vmem>>, vector<16x6xf32>
    %c0_117 = arith.constant 0 : index
    %c604 = arith.constant 604 : index
    %126 = vector.load %arg1[%c0_117, %c604] : memref<16x640xf32, #tpu.memory_space<vmem>>, vector<16x4xf32>
    %c0_118 = arith.constant 0 : index
    %c622 = arith.constant 622 : index
    %127 = vector.load %arg1[%c0_118, %c622] : memref<16x640xf32, #tpu.memory_space<vmem>>, vector<16x6xf32>
    %c0_119 = arith.constant 0 : index
    %c608 = arith.constant 608 : index
    %128 = vector.load %arg1[%c0_119, %c608] : memref<16x640xf32, #tpu.memory_space<vmem>>, vector<16x4xf32>
    %c0_120 = arith.constant 0 : index
    %c628 = arith.constant 628 : index
    %129 = vector.load %arg1[%c0_120, %c628] : memref<16x640xf32, #tpu.memory_space<vmem>>, vector<16x6xf32>
    %c0_121 = arith.constant 0 : index
    %c612 = arith.constant 612 : index
    %130 = vector.load %arg1[%c0_121, %c612] : memref<16x640xf32, #tpu.memory_space<vmem>>, vector<16x4xf32>
    %c0_122 = arith.constant 0 : index
    %c634 = arith.constant 634 : index
    %131 = vector.load %arg1[%c0_122, %c634] : memref<16x640xf32, #tpu.memory_space<vmem>>, vector<16x6xf32>
    %132 = tpu.concatenate %109, %110, %111, %112, %113, %114, %115, %116, %117, %118, %119, %120, %121, %122, %123, %124 in 1 : vector<16x2xf32>, vector<16x10xf32>, vector<16x6xf32>, vector<16x4xf32>, vector<16x6xf32>, vector<16x4xf32>, vector<16x6xf32>, vector<16x4xf32>, vector<16x10xf32>, vector<16x6xf32>, vector<16x4xf32>, vector<16x6xf32>, vector<16x4xf32>, vector<16x6xf32>, vector<16x4xf32>, vector<16x10xf32> -> vector<16x92xf32>
    %133 = tpu.concatenate %125, %126, %127, %128, %129, %130, %131 in 1 : vector<16x6xf32>, vector<16x4xf32>, vector<16x6xf32>, vector<16x4xf32>, vector<16x6xf32>, vector<16x4xf32>, vector<16x6xf32> -> vector<16x36xf32>
    %134 = tpu.concatenate %132, %133 in 1 : vector<16x92xf32>, vector<16x36xf32> -> vector<16x128xf32>
    %c0_123 = arith.constant 0 : index
    %c512 = arith.constant 512 : index
    %135 = vector.load %arg2[%c0_123, %c512] : memref<16x640xf32, #tpu.memory_space<vmem>>, vector<16x128xf32>
    tpu.vector_store %arg2[%c0_123, %c512], %134 {strides = array<i32>} : memref<16x640xf32, #tpu.memory_space<vmem>>, vector<16x128xf32>,
    return
  }
  func.func @transform_0(%arg0: i32) -> (i32, i32) {
    %c0_i32 = arith.constant 0 : i32
    %c0_i32_0 = arith.constant 0 : i32
    return %arg0, %c0_i32 : i32, i32
  }
  func.func @transform_1(%arg0: i32) -> (i32, i32) {
    %c0_i32 = arith.constant 0 : i32
    %c0_i32_0 = arith.constant 0 : i32
    return %arg0, %c0_i32 : i32, i32
  }
}

</mosaic_0001>

<bundles_post_ra>
// kernel: tpu_custom_call.1
= control target key start
LH: loop header
LB: loop body
LE: loop exit
PB: predicated region body
PF: predicated region fallthrough
CT: control target
= control target key end

     0   :  { %6 = vsyncpa [#allocation3], 0  ;;  %s1690_s0 = inlined_call_operand.hbm [shape: f32[16,640], index: 0, kind: input, shape index: {}]   ;;  %s1691_s1 = inlined_call_operand.hbm [shape: f32[16,640], index: 1, kind: output, shape index: {}]  }
   0x1   :  { %7 = vsyncpa [#allocation4], 0  ;;  %s932_s6 = smov [#allocation2]   ;;  %s884_s10 = scalar_lea.hbm %s1690_s0, 1280 }
   0x2   :  { %s13_s7 = sshll.u32 %s932_s6, 4  ;;  %p885_p0 = scmp.ne.s32.totalorder %s1690_s0, %s884_s10  ;;  %s14_s7 = int_to_ptr.vmem [resolvable:$true] %s13_s7 }
   0x3   :  { %p888_p1 = scmp.lt.u32.totalorder %s884_s10, %s1690_s0 }
   0x5   :  { %p890_p2 = pnand %p888_p1, %p885_p0 }
   0x7   :  { %893 = shalt.err (!%p890_p2)
}
   0x8   :  { %s894_s15 = scalar_lea.vmem %s14_s7, 1280  ;;  %p899_p4 = scmp.lt.s32.totalorder %s14_s7, %s14_s7 }
   0x9   :  { %p895_p3 = scmp.ne.s32.totalorder %s14_s7, %s894_s15  ;;  %p900_p5 = scmp.lt.s32.totalorder %s894_s15, %s894_s15 }
   0xb   :  { %p901_p6 = por %p900_p5, %p899_p4 }
   0xd   :  { %p902_p7 = pnand %p901_p6, %p895_p3 }
   0xf   :  { %905 = shalt.err (!%p902_p7)
}
  0x10   :  { %s933_s16 = smov 640   ;;  %s934_s17 = smov 40  }
  0x11   :  { %19 = dma.hbm_to_vmem [thread:$0]  %s1690_s0, 1280, %s14_s7, [#allocation3], %s933_s16, %s933_s16, %s934_s17  }
  0x12   :  { %928 = dma.done.wait [#allocation3], 1280  }
  0x13   :  { %929 = vsyncadd [#allocation3], 4294966016  ;;  %v989_v0 = vld [vmem:[#allocation2] sm:$0xff]  ;;  %s935_s20 = smov 6   ;;  %s936_s21 = smov 116   ;;  %v995_v1 = vld [vmem:[#allocation2 + $0x28] sm:$0xff] }
  0x14   :  { %35 = vrot.lane.b32.xlu1 %v989_v0, %s935_s20  ;;  %29 = vrot.lane.b32.xlu0 %v989_v0, %s936_s21  ;;  %s937_s0 = smov 120   ;;  %s938_s22 = smov 12   ;;  %v1041_v2 = vld [vmem:[#allocation2 + $0x30] sm:$0xff]  ;;  %v1043_v3 = vld [vmem:[#allocation2 + $0x8] sm:$0xff]  ;;  %v1095_v4 = vld [vmem:[#allocation2 + $0x38] sm:$0xff]  ;;  %vm65_vm0 = vcmask 31744  }
  0x15   :  { %s939_s23 = smov 124   ;;  %s940_s24 = smov 18   ;;  %v1097_v5 = vld [vmem:[#allocation2 + $0x10] sm:$0xff]  ;;  %vm68_vm1 = vcmask 80896   ;;  %vm71_vm2 = vcmask 113664   ;;  %vm74_vm3 = vcmask 162816  }
  0x16   :  { %s941_s25 = smov 44   ;;  %s942_s26 = smov 30   ;;  %vm77_vm4 = vcmask 195584   ;;  %vm83_vm5 = vcmask 277504   ;;  %vm234_vm6 = vcmask 48128   ;;  %vm1701_vm7 = vcmask 130048  }
  0x17   :  { %s943_s27 = smov 50   ;;  %s944_s28 = smov 34   ;;  %vm1696_vm8 = vcmask 244736   ;;  %vm1695_vm9 = vcmask 326656   ;;  %vm1702_vm10 = vcmask 293888   ;;  %vm86_vm11 = vcmask 359424  }
  0x18   :  { %37 = vrot.lane.b32.xlu1 %v995_v1, %s935_s20  ;;  %31 = vrot.lane.b32.xlu0 %v995_v1, %s936_s21  ;;  %s945_s29 = smov 56   ;;  %s946_s30 = smov 38   ;;  %vm1692_vm12 = vcmask 408576   ;;  %vm92_vm13 = vcmask 441344   ;;  %vm1694_vm14 = vcmask 490496   ;;  %vm98_vm15 = vcmask 523264  }
  0x19   :  { %s947_s2 = smov 26   ;;  %s948_s3 = smov 54  }
  0x1a   :  { %s949_s4 = smov 60   ;;  %s950_s5 = smov 42  }
  0x1b   :  { %s951_s6 = smov 48   ;;  %s952_s7 = smov 90  }
  0x1c   :  { %43 = vrot.lane.b32.xlu1 %v995_v1, %s937_s0  ;;  %41 = vrot.lane.b32.xlu0 %v989_v0, %s937_s0  ;;  %s953_s8 = smov 86   ;;  %s954_s9 = smov 36  }
  0x1d   :  { %s955_s10 = smov 58   ;;  %s956_s11 = smov 28  }
  0x1e   :  { %s957_s12 = smov 46   ;;  %s958_s13 = smov 32  }
  0x1f   :  { %s959_s14 = smov 52   ;;  %s960_s15 = smov 88  }
  0x20   :  { %49 = vrot.lane.b32.xlu1 %v995_v1, %s938_s22  ;;  %47 = vrot.lane.b32.xlu0 %v989_v0, %s938_s22  ;;  %s961_s18 = smov 24   ;;  %s962_s19 = smov 92  }
  0x24   :  { %55 = vrot.lane.b32.xlu1 %v995_v1, %s939_s23  ;;  %53 = vrot.lane.b32.xlu0 %v989_v0, %s939_s23 }
  0x28   :  { %61 = vrot.lane.b32.xlu1 %v995_v1, %s940_s24  ;;  %59 = vrot.lane.b32.xlu0 %v989_v0, %s940_s24 }
  0x2c   :  { %112 = vrot.lane.b32.xlu1 %v995_v1, %s941_s25  ;;  %110 = vrot.lane.b32.xlu0 %v989_v0, %s941_s25 }
  0x30   :  { %118 = vrot.lane.b32.xlu1 %v995_v1, %s942_s26  ;;  %116 = vrot.lane.b32.xlu0 %v989_v0, %s942_s26 }
  0x34   :  { %124 = vrot.lane.b32.xlu1 %v995_v1, %s943_s27  ;;  %122 = vrot.lane.b32.xlu0 %v989_v0, %s943_s27 }
  0x38   :  { %130 = vrot.lane.b32.xlu1 %v995_v1, %s944_s28  ;;  %128 = vrot.lane.b32.xlu0 %v989_v0, %s944_s28 }
  0x3c   :  { %136 = vrot.lane.b32.xlu1 %v995_v1, %s945_s29  ;;  %134 = vrot.lane.b32.xlu0 %v989_v0, %s945_s29 }
  0x40   :  { %142 = vrot.lane.b32.xlu1 %v995_v1, %s946_s30  ;;  %140 = vrot.lane.b32.xlu0 %v989_v0, %s946_s30 }
  0x44   :  { %150 = vrot.lane.b32.xlu1 %v1041_v2, %s947_s2  ;;  %148 = vrot.lane.b32.xlu0 %v1043_v3, %s947_s2 }
  0x48   :  { %189 = vrot.lane.b32.xlu1 %v1041_v2, %s936_s21  ;;  %187 = vrot.lane.b32.xlu0 %v1043_v3, %s936_s21 }
  0x4c   :  { %197 = vrot.lane.b32.xlu1 %v995_v1, %s935_s20  ;;  %195 = vrot.lane.b32.xlu0 %v989_v0, %s935_s20 }
  0x50   :  { %203 = vrot.lane.b32.xlu1 %v1041_v2, %s937_s0  ;;  %201 = vrot.lane.b32.xlu0 %v1043_v3, %s937_s0 }
  0x54   :  { %209 = vrot.lane.b32.xlu1 %v1041_v2, %s938_s22  ;;  %207 = vrot.lane.b32.xlu0 %v1043_v3, %s938_s22 }
  0x58   :  { %215 = vrot.lane.b32.xlu1 %v1041_v2, %s939_s23  ;;  %213 = vrot.lane.b32.xlu0 %v1043_v3, %s939_s23 }
  0x5c   :  { %221 = vrot.lane.b32.xlu1 %v1041_v2, %s940_s24  ;;  %219 = vrot.lane.b32.xlu0 %v1043_v3, %s940_s24 }
  0x60   :  { %227 = vrot.lane.b32.xlu1 %v1041_v2, %s935_s20  ;;  %225 = vrot.lane.b32.xlu0 %v1043_v3, %s935_s20 }
  0x64   :  { %278 = vrot.lane.b32.xlu1 %v1041_v2, %s944_s28  ;;  %276 = vrot.lane.b32.xlu0 %v1043_v3, %s944_s28 }
  0x68   :  { %284 = vrot.lane.b32.xlu1 %v1041_v2, %s948_s3  ;;  %282 = vrot.lane.b32.xlu0 %v1043_v3, %s948_s3 }
  0x6c   :  { %290 = vrot.lane.b32.xlu1 %v1041_v2, %s946_s30  ;;  %288 = vrot.lane.b32.xlu0 %v1043_v3, %s946_s30 }
  0x70   :  { %296 = vrot.lane.b32.xlu1 %v1041_v2, %s949_s4  ;;  %294 = vrot.lane.b32.xlu0 %v1043_v3, %s949_s4 }
  0x74   :  { %302 = vrot.lane.b32.xlu1 %v1041_v2, %s950_s5  ;;  %300 = vrot.lane.b32.xlu0 %v1043_v3, %s950_s5 }
  0x78   :  { %310 = vrot.lane.b32.xlu1 %v1095_v4, %s942_s26  ;;  %308 = vrot.lane.b32.xlu0 %v1097_v5, %s942_s26 }
  0x7c   :  { %316 = vrot.lane.b32.xlu1 %v1041_v2, %s951_s6  ;;  %314 = vrot.lane.b32.xlu0 %v1043_v3, %s951_s6 }
  0x80   :  { %322 = vrot.lane.b32.xlu1 %v1095_v4, %s944_s28  ;;  %320 = vrot.lane.b32.xlu0 %v1097_v5, %s944_s28 }
  0x84   :  { %364 = vrot.lane.b32.xlu1 %v1095_v4, %s937_s0  ;;  %362 = vrot.lane.b32.xlu0 %v1097_v5, %s937_s0 }
  0x86   :  { %v1115_v6 = vpop.permute.xlu1 %35  ;;  %v1117_v7 = vpop.permute.xlu0 %29 }
  0x88   :  { %372 = vrot.lane.b32.xlu1 %v1041_v2, %s938_s22  ;;  %370 = vrot.lane.b32.xlu0 %v1043_v3, %s938_s22 }
  0x8a   :  { %v1123_v8 = vpop.permute.xlu1 %37  ;;  %v1125_v9 = vpop.permute.xlu0 %31 }
  0x8c   :  { %378 = vrot.lane.b32.xlu1 %v1095_v4, %s939_s23  ;;  %376 = vrot.lane.b32.xlu0 %v1097_v5, %s939_s23 }
  0x8e   :  { %v1131_v10 = vpop.permute.xlu1 %43  ;;  %v1133_v11 = vpop.permute.xlu0 %41 }
  0x92   :  { %v1135_v12 = vpop.permute.xlu1 %49  ;;  %v1137_v13 = vpop.permute.xlu0 %47 }
  0x96   :  { %v1139_v14 = vpop.permute.xlu1 %55  ;;  %v1141_v15 = vpop.permute.xlu0 %53 }
  0x9a   :  { %v1143_v16 = vpop.permute.xlu1 %61  ;;  %v1145_v17 = vpop.permute.xlu0 %59 }
  0x9e   :  { %v113_v18 = vpop.permute.xlu1 %112  ;;  %v111_v19 = vpop.permute.xlu0 %110 }
  0xa2   :  { %v119_v20 = vpop.permute.xlu1 %118  ;;  %v117_v21 = vpop.permute.xlu0 %116 }
  0xa3   :  { %v155_v28 = vsel %vm65_vm0, %v113_v18, %v119_v20  ;;  %v154_v29 = vsel %vm65_vm0, %v111_v19, %v117_v21 }
  0xa6   :  { %v125_v22 = vpop.permute.xlu1 %124  ;;  %v123_v23 = vpop.permute.xlu0 %122 }
  0xa7   :  { %v157_v32 = vsel %vm68_vm1, %v155_v28, %v125_v22  ;;  %v156_v33 = vsel %vm68_vm1, %v154_v29, %v123_v23 }
  0xaa   :  { %v131_v24 = vpop.permute.xlu1 %130  ;;  %v129_v25 = vpop.permute.xlu0 %128 }
  0xab   :  { %v159_v34 = vsel %vm71_vm2, %v157_v32, %v131_v24  ;;  %v158_v35 = vsel %vm71_vm2, %v156_v33, %v129_v25 }
  0xae   :  { %v137_v26 = vpop.permute.xlu1 %136  ;;  %v135_v27 = vpop.permute.xlu0 %134 }
  0xaf   :  { %v161_v36 = vsel %vm74_vm3, %v159_v34, %v137_v26  ;;  %v160_v37 = vsel %vm74_vm3, %v158_v35, %v135_v27 }
  0xb2   :  { %v143_v30 = vpop.permute.xlu1 %142  ;;  %v141_v31 = vpop.permute.xlu0 %140 }
  0xb3   :  { %v163_v38 = vsel %vm77_vm4, %v161_v36, %v143_v30  ;;  %v162_v39 = vsel %vm77_vm4, %v160_v37, %v141_v31 }
  0xb6   :  { %v151_v40 = vpop.permute.xlu1 %150  ;;  %v149_v41 = vpop.permute.xlu0 %148 }
  0xb7   :  { %v165_v42 = vsel %vm83_vm5, %v163_v38, %v151_v40  ;;  %v164_v43 = vsel %vm83_vm5, %v162_v39, %v149_v41 }
  0xb8   :  { %170 = vrot.lane.b32.xlu1 %v165_v42, %s952_s7  ;;  %168 = vrot.lane.b32.xlu0 %v164_v43, %s952_s7  ;;  %v66_v42 = vsel %vm65_vm0, %v989_v0, %v1117_v7  ;;  %v67_v43 = vsel %vm65_vm0, %v995_v1, %v1125_v9 }
  0xba   :  { %v1161_v44 = vpop.permute.xlu1 %189  ;;  %v1163_v45 = vpop.permute.xlu0 %187 }
  0xbe   :  { %v1165_v46 = vpop.permute.xlu1 %197  ;;  %v1167_v47 = vpop.permute.xlu0 %195 }
  0xc2   :  { %v1169_v48 = vpop.permute.xlu1 %203  ;;  %v1171_v49 = vpop.permute.xlu0 %201 }
  0xc6   :  { %v1173_v50 = vpop.permute.xlu1 %209  ;;  %v1175_v51 = vpop.permute.xlu0 %207 }
  0xca   :  { %v1177_v52 = vpop.permute.xlu1 %215  ;;  %v1179_v53 = vpop.permute.xlu0 %213 }
  0xce   :  { %v1181_v54 = vpop.permute.xlu1 %221  ;;  %v1183_v55 = vpop.permute.xlu0 %219 }
  0xd2   :  { %v1185_v56 = vpop.permute.xlu1 %227  ;;  %v1187_v57 = vpop.permute.xlu0 %225 }
  0xd6   :  { %v279_v58 = vpop.permute.xlu1 %278  ;;  %v277_v59 = vpop.permute.xlu0 %276 }
  0xda   :  { %v285_v60 = vpop.permute.xlu1 %284  ;;  %v283_v61 = vpop.permute.xlu0 %282 }
  0xdb   :  { %v327_v24 = vsel %vm234_vm6, %v279_v58, %v285_v60  ;;  %v326_v25 = vsel %vm234_vm6, %v277_v59, %v283_v61  ;;  %v70_v58 = vsel %vm68_vm1, %v67_v43, %v1123_v8  ;;  %v69_v59 = vsel %vm68_vm1, %v66_v42, %v1115_v6 }
  0xdc   :  { %v73_v60 = vsel %vm71_vm2, %v70_v58, %v1131_v10  ;;  %v72_v61 = vsel %vm71_vm2, %v69_v59, %v1133_v11 }
  0xde   :  { %v291_v62 = vpop.permute.xlu1 %290  ;;  %v289_v63 = vpop.permute.xlu0 %288 }
  0xdf   :  { %v329_v26 = vsel %vm68_vm1, %v327_v24, %v291_v62  ;;  %v328_v27 = vsel %vm68_vm1, %v326_v25, %v289_v63  ;;  %v76_v62 = vsel %vm74_vm3, %v73_v60, %v1135_v12  ;;  %v75_v63 = vsel %vm74_vm3, %v72_v61, %v1137_v13 }
  0xe2   :  { %v297_v18 = vpop.permute.xlu1 %296  ;;  %v295_v19 = vpop.permute.xlu0 %294 }
  0xe3   :  { %v331_v30 = vsel %vm1701_vm7, %v329_v26, %v297_v18  ;;  %v330_v31 = vsel %vm1701_vm7, %v328_v27, %v295_v19  ;;  %v79_v18 = vsel %vm77_vm4, %v76_v62, %v1139_v14  ;;  %v78_v19 = vsel %vm77_vm4, %v75_v63, %v1141_v15 }
  0xe4   :  { %vm1693_vm4 = vcmask 572416  }
  0xe6   :  { %v303_v20 = vpop.permute.xlu1 %302  ;;  %v301_v21 = vpop.permute.xlu0 %300 }
  0xe7   :  { %v333_v32 = vsel %vm74_vm3, %v331_v30, %v303_v20  ;;  %v332_v33 = vsel %vm74_vm3, %v330_v31, %v301_v21  ;;  %v82_v20 = vsel %vm1696_vm8, %v79_v18, %v1143_v16  ;;  %v81_v21 = vsel %vm1696_vm8, %v78_v19, %v1145_v17 }
  0xea   :  { %v311_v22 = vpop.permute.xlu1 %310  ;;  %v309_v23 = vpop.permute.xlu0 %308 }
  0xeb   :  { %v335_v34 = vsel %vm1696_vm8, %v333_v32, %v311_v22  ;;  %v334_v35 = vsel %vm1696_vm8, %v332_v33, %v309_v23  ;;  %v85_v22 = vsel %vm83_vm5, %v82_v20, %v995_v1  ;;  %v84_v23 = vsel %vm83_vm5, %v81_v21, %v989_v0 }
  0xec   :  { %v88_v24 = vsel %vm86_vm11, %v85_v22, %v1125_v9  ;;  %v87_v25 = vsel %vm86_vm11, %v84_v23, %v1117_v7  ;;  %vm1700_vm8 = vcmask 179200  }
  0xed   :  { %v91_v26 = vsel %vm1692_vm12, %v88_v24, %v1123_v8  ;;  %v90_v27 = vsel %vm1692_vm12, %v87_v25, %v1115_v6  ;;  %v1285_v6 = vld [vmem:[#allocation2 + $0x18] sm:$0xff]  ;;  %vm104_vm12 = vcmask 605184  }
  0xee   :  { %v317_v28 = vpop.permute.xlu1 %316  ;;  %v315_v29 = vpop.permute.xlu0 %314  ;;  %v94_v30 = vsel %vm92_vm13, %v91_v26, %v1131_v10  ;;  %v93_v8 = vsel %vm92_vm13, %v90_v27, %v1133_v11 }
  0xef   :  { %v337_v36 = vsel %vm1702_vm10, %v335_v34, %v317_v28  ;;  %v336_v37 = vsel %vm1702_vm10, %v334_v35, %v315_v29  ;;  %v97_v31 = vsel %vm1694_vm14, %v94_v30, %v1135_v12  ;;  %v96_v32 = vsel %vm1694_vm14, %v93_v8, %v1137_v13  ;;  %v1301_v12 = vld [vmem:[#allocation2 + $0x40] sm:$0xff] }
  0xf0   :  { %v100_v11 = vsel %vm98_vm15, %v97_v31, %v1139_v14  ;;  %v99_v34 = vsel %vm98_vm15, %v96_v32, %v1141_v15  ;;  %vm107_vm15 = vcmask 687104   ;;  %vm1699_vm14 = vcmask 15360  }
  0xf1   :  { %v103_v13 = vsel %vm1693_vm4, %v100_v11, %v1143_v16  ;;  %v102_v35 = vsel %vm1693_vm4, %v99_v34, %v1145_v17  ;;  %vm1697_vm4 = vcmask 736256  }
  0xf2   :  { %v323_v38 = vpop.permute.xlu1 %322  ;;  %v321_v39 = vpop.permute.xlu0 %320  ;;  %v106_v15 = vsel %vm104_vm12, %v103_v13, %v995_v1 }
  0xf3   :  { %v340_v40 = vsel %vm1695_vm9, %v337_v36, %v323_v38  ;;  %v339_v41 = vsel %vm1695_vm9, %v336_v37, %v321_v39  ;;  %v105_v37 = vsel %vm104_vm12, %v102_v35, %v989_v0  ;;  %v109_v17 = vsel %vm107_vm15, %v106_v15, %v1125_v9 }
  0xf4   :  { %345 = vrot.lane.b32.xlu1 %v340_v40, %s953_s8  ;;  %343 = vrot.lane.b32.xlu0 %v339_v41, %s953_s8  ;;  %v108_v38 = vsel %vm107_vm15, %v105_v37, %v1117_v7  ;;  %vm1698_vm9 = vcmask 97280   ;;  %v233_v0 = vsel %vm1699_vm14, %v1161_v44, %v1165_v46  ;;  %v232_v9 = vsel %vm1699_vm14, %v1163_v45, %v1167_v47 }
  0xf5   :  { %v236_v7 = vsel %vm234_vm6, %v233_v0, %v1169_v48  ;;  %v235_v41 = vsel %vm234_vm6, %v232_v9, %v1171_v49  ;;  %vm1704_vm14 = vcmask 375808  }
  0xf6   :  { %v1275_v28 = vpop.permute.xlu1 %364  ;;  %v1277_v29 = vpop.permute.xlu0 %362  ;;  %v239_v42 = vsel %vm1698_vm9, %v236_v7, %v1173_v50  ;;  %v238_v43 = vsel %vm1698_vm9, %v235_v41, %v1175_v51  ;;  %vm1703_vm9 = vcmask 343040  }
  0xf7   :  { %v242_v46 = vsel %vm1701_vm7, %v239_v42, %v1177_v52  ;;  %v241_v58 = vsel %vm1701_vm7, %v238_v43, %v1179_v53  ;;  %vm261_vm7 = vcmask 457728  }
  0xf8   :  { %384 = vrot.lane.b32.xlu1 %v1041_v2, %s940_s24  ;;  %382 = vrot.lane.b32.xlu0 %v1043_v3, %s940_s24  ;;  %v245_v47 = vsel %vm1700_vm8, %v242_v46, %v1181_v54  ;;  %v244_v59 = vsel %vm1700_vm8, %v241_v58, %v1183_v55  ;;  %vm1705_vm8 = vcmask 424960  }
  0xfa   :  { %v1291_v33 = vpop.permute.xlu1 %372  ;;  %v1293_v10 = vpop.permute.xlu0 %370 }
  0xfc   :  { %390 = vrot.lane.b32.xlu1 %v1095_v4, %s936_s21  ;;  %388 = vrot.lane.b32.xlu0 %v1097_v5, %s936_s21 }
  0xfe   :  { %v1311_v36 = vpop.permute.xlu1 %378  ;;  %v1313_v14 = vpop.permute.xlu0 %376 }
 0x100   :  { %396 = vrot.lane.b32.xlu1 %v1095_v4, %s935_s20  ;;  %394 = vrot.lane.b32.xlu0 %v1097_v5, %s935_s20 }
 0x104   :  { %402 = vrot.lane.b32.xlu1 %v1095_v4, %s938_s22  ;;  %400 = vrot.lane.b32.xlu0 %v1097_v5, %s938_s22 }
 0x108   :  { %408 = vrot.lane.b32.xlu1 %v1095_v4, %s940_s24  ;;  %406 = vrot.lane.b32.xlu0 %v1097_v5, %s940_s24 }
 0x10c   :  { %452 = vrot.lane.b32.xlu1 %v1095_v4, %s954_s9  ;;  %450 = vrot.lane.b32.xlu0 %v1097_v5, %s954_s9 }
 0x110   :  { %458 = vrot.lane.b32.xlu1 %v1095_v4, %s955_s10  ;;  %456 = vrot.lane.b32.xlu0 %v1097_v5, %s955_s10 }
 0x114   :  { %464 = vrot.lane.b32.xlu1 %v1095_v4, %s934_s17  ;;  %462 = vrot.lane.b32.xlu0 %v1097_v5, %s934_s17 }
 0x118   :  { %470 = vrot.lane.b32.xlu1 %v1095_v4, %s956_s11  ;;  %468 = vrot.lane.b32.xlu0 %v1097_v5, %s956_s11 }
 0x11c   :  { %476 = vrot.lane.b32.xlu1 %v1095_v4, %s957_s12  ;;  %474 = vrot.lane.b32.xlu0 %v1097_v5, %s957_s12 }
 0x120   :  { %484 = vrot.lane.b32.xlu1 %v1285_v6, %s958_s13  ;;  %482 = vrot.lane.b32.xlu0 %v1097_v5, %s958_s13 }
 0x124   :  { %488 = vrot.lane.b32.xlu1 %v1301_v12, %s958_s13  ;;  %486 = vrot.lane.b32.xlu0 %v1095_v4, %s958_s13 }
 0x128   :  { %497 = vrot.lane.b32.xlu1 %v1095_v4, %s959_s14  ;;  %495 = vrot.lane.b32.xlu0 %v1097_v5, %s959_s14 }
 0x12a   :  { %v171_v16 = vpop.permute.xlu1 %170  ;;  %v169_v39 = vpop.permute.xlu0 %168 }
 0x12b   :  { %v176_v1 = vsel %vm1697_vm4, %v109_v17, %v171_v16  ;;  %v175_v40 = vsel %vm1697_vm4, %v108_v38, %v169_v39  ;;  %vm246_vm4 = vcmask 211968  }
 0x12c   :  { %178 = vst [vmem:[#allocation5 + $0x28] sm:$0xff] %v176_v1  ;;  %177 = vst [vmem:[#allocation5] sm:$0xff] %v175_v40  ;;  %v248_v60 = vsel %vm246_vm4, %v245_v47, %v1041_v2  ;;  %v247_v61 = vsel %vm246_vm4, %v244_v59, %v1043_v3 }
 0x12d   :  { %v251_v62 = vsel %vm1702_vm10, %v248_v60, %v1161_v44  ;;  %v250_v63 = vsel %vm1702_vm10, %v247_v61, %v1163_v45  ;;  %vm1706_vm10 = vcmask 506880  }
 0x12e   :  { %v254_v18 = vsel %vm1703_vm9, %v251_v62, %v1185_v56  ;;  %v253_v19 = vsel %vm1703_vm9, %v250_v63, %v1187_v57  ;;  %vm267_vm9 = vcmask 539648  }
 0x12f   :  { %v257_v20 = vsel %vm1704_vm14, %v254_v18, %v1169_v48  ;;  %v256_v21 = vsel %vm1704_vm14, %v253_v19, %v1171_v49  ;;  %vm1708_vm14 = vcmask 621568  }
 0x130   :  { %v260_v22 = vsel %vm1705_vm8, %v257_v20, %v1173_v50  ;;  %v259_v23 = vsel %vm1705_vm8, %v256_v21, %v1175_v51  ;;  %vm1707_vm8 = vcmask 670720  }
 0x131   :  { %v263_v24 = vsel %vm261_vm7, %v260_v22, %v1177_v52  ;;  %v262_v25 = vsel %vm261_vm7, %v259_v23, %v1179_v53  ;;  %vm1709_vm7 = vcmask 703488  }
 0x132   :  { %v266_v26 = vsel %vm1706_vm10, %v263_v24, %v1181_v54  ;;  %v265_v48 = vsel %vm1706_vm10, %v262_v25, %v1183_v55  ;;  %vm414_vm10 = vcmask 64512  }
 0x133   :  { %v269_v49 = vsel %vm267_vm9, %v266_v26, %v1041_v2  ;;  %v268_v50 = vsel %vm267_vm9, %v265_v48, %v1043_v3  ;;  %v413_v3 = vsel %vm65_vm0, %v1275_v28, %v1291_v33 }
 0x134   :  { %v272_v51 = vsel %vm1708_vm14, %v269_v49, %v1161_v44  ;;  %v271_v52 = vsel %vm1708_vm14, %v268_v50, %v1163_v45  ;;  %v412_v44 = vsel %vm65_vm0, %v1277_v29, %v1293_v10  ;;  %vm422_vm14 = vcmask 228352  }
 0x135   :  { %v275_v53 = vsel %vm1707_vm8, %v272_v51, %v1185_v56  ;;  %v274_v54 = vsel %vm1707_vm8, %v271_v52, %v1187_v57  ;;  %v416_v56 = vsel %vm414_vm10, %v413_v3, %v1311_v36  ;;  %v415_v57 = vsel %vm414_vm10, %v412_v44, %v1313_v14 }
 0x136   :  { %vm419_vm8 = vcmask 146432   ;;  %vm427_vm0 = vcmask 310272   ;;  %vm437_vm10 = vcmask 474112  }
 0x166   :  { %v346_v55 = vpop.permute.xlu1 %345  ;;  %v344_v2 = vpop.permute.xlu0 %343 }
 0x167   :  { %v351_v45 = vsel %vm1709_vm7, %v275_v53, %v346_v55  ;;  %v350_v27 = vsel %vm1709_vm7, %v274_v54, %v344_v2  ;;  %vm1711_vm7 = vcmask 556032  }
 0x168   :  { %353 = vst [vmem:[#allocation5 + $0x30] sm:$0xff] %v351_v45  ;;  %352 = vst [vmem:[#allocation5 + $0x8] sm:$0xff] %v350_v27 }
 0x16a   :  { %v385_v30 = vpop.permute.xlu1 %384  ;;  %v383_v8 = vpop.permute.xlu0 %382 }
 0x16b   :  { %v418_v31 = vsel %vm71_vm2, %v416_v56, %v385_v30  ;;  %v417_v32 = vsel %vm71_vm2, %v415_v57, %v383_v8  ;;  %vm432_vm2 = vcmask 392192  }
 0x16c   :  { %v421_v33 = vsel %vm419_vm8, %v418_v31, %v1095_v4  ;;  %v420_v11 = vsel %vm419_vm8, %v417_v32, %v1097_v5 }
 0x16e   :  { %v391_v10 = vpop.permute.xlu1 %390  ;;  %v389_v34 = vpop.permute.xlu0 %388 }
 0x16f   :  { %v424_v13 = vsel %vm422_vm14, %v421_v33, %v391_v10  ;;  %v423_v35 = vsel %vm422_vm14, %v420_v11, %v389_v34  ;;  %v1457_v11 = vld [vmem:[#allocation2 + $0x48] sm:$0xff] }
 0x172   :  { %v397_v15 = vpop.permute.xlu1 %396  ;;  %v395_v37 = vpop.permute.xlu0 %394 }
 0x173   :  { %v426_v16 = vsel %vm83_vm5, %v424_v13, %v397_v15  ;;  %v425_v17 = vsel %vm83_vm5, %v423_v35, %v395_v37 }
 0x174   :  { %v429_v38 = vsel %vm427_vm0, %v426_v16, %v1275_v28  ;;  %v428_v1 = vsel %vm427_vm0, %v425_v17, %v1277_v29 }
 0x176   :  { %v403_v39 = vpop.permute.xlu1 %402  ;;  %v401_v40 = vpop.permute.xlu0 %400 }
 0x177   :  { %v431_v0 = vsel %vm86_vm11, %v429_v38, %v403_v39  ;;  %v430_v9 = vsel %vm86_vm11, %v428_v1, %v401_v40  ;;  %vm1710_vm11 = vcmask 637952  }
 0x178   :  { %v434_v7 = vsel %vm432_vm2, %v431_v0, %v1311_v36  ;;  %v433_v42 = vsel %vm432_vm2, %v430_v9, %v1313_v14  ;;  %vm1714_vm2 = vcmask 293888  }
 0x17a   :  { %v409_v41 = vpop.permute.xlu1 %408  ;;  %v407_v43 = vpop.permute.xlu0 %406 }
 0x17b   :  { %v436_v46 = vsel %vm92_vm13, %v434_v7, %v409_v41  ;;  %v435_v58 = vsel %vm92_vm13, %v433_v42, %v407_v43  ;;  %vm1712_vm13 = vcmask 244736  }
 0x17c   :  { %v439_v47 = vsel %vm437_vm10, %v436_v46, %v1095_v4  ;;  %v438_v59 = vsel %vm437_vm10, %v435_v58, %v1097_v5 }
 0x17d   :  { %v442_v60 = vsel %vm1711_vm7, %v439_v47, %v391_v10  ;;  %v441_v36 = vsel %vm1711_vm7, %v438_v59, %v389_v34  ;;  %v1459_v34 = vld [vmem:[#allocation2 + $0x20] sm:$0xff] }
 0x17e   :  { %v453_v61 = vpop.permute.xlu1 %452  ;;  %v451_v62 = vpop.permute.xlu0 %450  ;;  %v444_v14 = vsel %vm104_vm12, %v442_v60, %v397_v15  ;;  %v443_v63 = vsel %vm104_vm12, %v441_v36, %v395_v37  ;;  %vm490_vm12 = vcmask 261120  }
 0x17f   :  { %v447_v18 = vsel %vm1710_vm11, %v444_v14, %v1275_v28  ;;  %v446_v19 = vsel %vm1710_vm11, %v443_v63, %v1277_v29  ;;  %vm1715_vm11 = vmmov %vm1714_vm2 }
 0x180   :  { %v1430_v20 = vsel %vm107_vm15, %v447_v18, %v403_v39  ;;  %v1433_v21 = vsel %vm107_vm15, %v446_v19, %v401_v40  ;;  %vm1713_vm15 = vmmov %vm1712_vm13 }
 0x182   :  { %v459_v22 = vpop.permute.xlu1 %458  ;;  %v457_v23 = vpop.permute.xlu0 %456 }
 0x183   :  { %v502_v28 = vsel %vm234_vm6, %v453_v61, %v459_v22  ;;  %v501_v29 = vsel %vm234_vm6, %v451_v62, %v457_v23 }
 0x186   :  { %v465_v24 = vpop.permute.xlu1 %464  ;;  %v463_v25 = vpop.permute.xlu0 %462 }
 0x187   :  { %v504_v55 = vsel %vm68_vm1, %v502_v28, %v465_v24  ;;  %v503_v2 = vsel %vm68_vm1, %v501_v29, %v463_v25 }
 0x18a   :  { %v471_v26 = vpop.permute.xlu1 %470  ;;  %v469_v48 = vpop.permute.xlu0 %468 }
 0x18b   :  { %v506_v45 = vsel %vm74_vm3, %v504_v55, %v471_v26  ;;  %v505_v27 = vsel %vm74_vm3, %v503_v2, %v469_v48 }
 0x18e   :  { %v477_v49 = vpop.permute.xlu1 %476  ;;  %v475_v50 = vpop.permute.xlu0 %474 }
 0x18f   :  { %v508_v56 = vsel %vm246_vm4, %v506_v45, %v477_v49  ;;  %v507_v57 = vsel %vm246_vm4, %v505_v27, %v475_v50 }
 0x192   :  { %v485_v51 = vpop.permute.xlu1 %484  ;;  %v483_v52 = vpop.permute.xlu0 %482 }
 0x193   :  { %v491_v3 = vsel %vm490_vm12, %v483_v52, %v485_v51 }
 0x194   :  { %v509_v32 = vsel %vm1713_vm15, %v507_v57, %v491_v3 }
 0x196   :  { %v489_v53 = vpop.permute.xlu1 %488  ;;  %v487_v54 = vpop.permute.xlu0 %486 }
 0x197   :  { %v492_v44 = vsel %vm490_vm12, %v487_v54, %v489_v53 }
 0x198   :  { %v510_v31 = vsel %vm1712_vm13, %v508_v56, %v492_v44  ;;  %vm1716_vm13 = vcmask 130048  }
 0x199   :  { %vm1717_vm15 = vmmov %vm1716_vm13 }
 0x19a   :  { %v498_v30 = vpop.permute.xlu1 %497  ;;  %v496_v8 = vpop.permute.xlu0 %495  ;;  %vm1722_vm7 = vmmov %vm1717_vm15 }
 0x19b   :  { %v512_v33 = vsel %vm1714_vm2, %v510_v31, %v498_v30  ;;  %v511_v10 = vsel %vm1715_vm11, %v509_v32, %v496_v8  ;;  %vm521_vm11 = vcmask 719872   ;;  %vm1718_vm2 = vcmask 244736  }
 0x19c   :  { %517 = vrot.lane.b32.xlu1 %v512_v33, %s960_s15  ;;  %515 = vrot.lane.b32.xlu0 %v511_v10, %s960_s15 }
 0x1a0   :  { %613 = vrot.lane.b32.xlu1 %v1301_v12, %s946_s30  ;;  %611 = vrot.lane.b32.xlu0 %v1285_v6, %s946_s30 }
 0x1a4   :  { %619 = vrot.lane.b32.xlu1 %v1301_v12, %s947_s2  ;;  %617 = vrot.lane.b32.xlu0 %v1285_v6, %s947_s2 }
 0x1a8   :  { %770 = vrot.lane.b32.xlu1 %v1457_v11, %s961_s18  ;;  %768 = vrot.lane.b32.xlu0 %v1459_v34, %s961_s18 }
 0x1ac   :  { %776 = vrot.lane.b32.xlu1 %v1457_v11, %s950_s5  ;;  %774 = vrot.lane.b32.xlu0 %v1459_v34, %s950_s5 }
 0x1b0   :  { %625 = vrot.lane.b32.xlu1 %v1301_v12, %s941_s25  ;;  %623 = vrot.lane.b32.xlu0 %v1285_v6, %s941_s25 }
 0x1b4   :  { %782 = vrot.lane.b32.xlu1 %v1457_v11, %s956_s11  ;;  %780 = vrot.lane.b32.xlu0 %v1459_v34, %s956_s11 }
 0x1b8   :  { %631 = vrot.lane.b32.xlu1 %v1301_v12, %s942_s26  ;;  %629 = vrot.lane.b32.xlu0 %v1285_v6, %s942_s26 }
 0x1bc   :  { %788 = vrot.lane.b32.xlu1 %v1457_v11, %s951_s6  ;;  %786 = vrot.lane.b32.xlu0 %v1459_v34, %s951_s6 }
 0x1c0   :  { %637 = vrot.lane.b32.xlu1 %v1301_v12, %s943_s27  ;;  %635 = vrot.lane.b32.xlu0 %v1285_v6, %s943_s27 }
 0x1c4   :  { %647 = vrot.lane.b32.xlu1 %v1459_v34, %s944_s28  ;;  %645 = vrot.lane.b32.xlu0 %v1285_v6, %s944_s28 }
 0x1c8   :  { %651 = vrot.lane.b32.xlu1 %v1457_v11, %s944_s28  ;;  %649 = vrot.lane.b32.xlu0 %v1301_v12, %s944_s28 }
 0x1cc   :  { %794 = vrot.lane.b32.xlu1 %v1457_v11, %s958_s13  ;;  %792 = vrot.lane.b32.xlu0 %v1459_v34, %s958_s13 }
 0x1d0   :  { %800 = vrot.lane.b32.xlu1 %v1457_v11, %s948_s3  ;;  %798 = vrot.lane.b32.xlu0 %v1459_v34, %s948_s3 }
 0x1d4   :  { %659 = vrot.lane.b32.xlu1 %v1301_v12, %s945_s29  ;;  %657 = vrot.lane.b32.xlu0 %v1285_v6, %s945_s29 }
 0x1d8   :  { %806 = vrot.lane.b32.xlu1 %v1457_v11, %s954_s9  ;;  %804 = vrot.lane.b32.xlu0 %v1459_v34, %s954_s9 }
 0x1dc   :  { %538 = vrot.lane.b32.xlu1 %v1301_v12, %s939_s23  ;;  %536 = vrot.lane.b32.xlu0 %v1285_v6, %s939_s23 }
 0x1e0   :  { %546 = vrot.lane.b32.xlu1 %v1095_v4, %s940_s24  ;;  %544 = vrot.lane.b32.xlu0 %v1097_v5, %s940_s24 }
 0x1e4   :  { %695 = vrot.lane.b32.xlu1 %v1301_v12, %s940_s24  ;;  %693 = vrot.lane.b32.xlu0 %v1285_v6, %s940_s24 }
 0x1e8   :  { %703 = vrot.lane.b32.xlu1 %v1457_v11, %s936_s21  ;;  %701 = vrot.lane.b32.xlu0 %v1459_v34, %s936_s21 }
 0x1ec   :  { %552 = vrot.lane.b32.xlu1 %v1301_v12, %s936_s21  ;;  %550 = vrot.lane.b32.xlu0 %v1285_v6, %s936_s21 }
 0x1f0   :  { %709 = vrot.lane.b32.xlu1 %v1457_v11, %s935_s20  ;;  %707 = vrot.lane.b32.xlu0 %v1459_v34, %s935_s20 }
 0x1f4   :  { %558 = vrot.lane.b32.xlu1 %v1301_v12, %s935_s20  ;;  %556 = vrot.lane.b32.xlu0 %v1285_v6, %s935_s20  ;;  %s963_s20 = smov [#allocation5]  }
 0x1f5   :  { %s840_s21 = sshll.u32 %s963_s20, 4  ;;  %s841_s21 = int_to_ptr.vmem [resolvable:$true] %s840_s21 }
 0x1f6   :  { %p911_p9 = scmp.lt.s32.totalorder %s841_s21, %s841_s21 }
 0x1f8   :  { %715 = vrot.lane.b32.xlu1 %v1457_v11, %s937_s0  ;;  %713 = vrot.lane.b32.xlu0 %v1459_v34, %s937_s0 }
 0x1fc   :  { %564 = vrot.lane.b32.xlu1 %v1301_v12, %s937_s0  ;;  %562 = vrot.lane.b32.xlu0 %v1285_v6, %s937_s0  ;;  %s906_s0 = scalar_lea.vmem %s841_s21, 1280 }
 0x1fd   :  { %p907_p8 = scmp.ne.s32.totalorder %s841_s21, %s906_s0  ;;  %p912_p10 = scmp.lt.s32.totalorder %s906_s0, %s906_s0 }
 0x1ff   :  { %p913_p11 = por %p912_p10, %p911_p9 }
 0x200   :  { %721 = vrot.lane.b32.xlu1 %v1457_v11, %s938_s22  ;;  %719 = vrot.lane.b32.xlu0 %v1459_v34, %s938_s22 }
 0x201   :  { %p914_p12 = pnand %p913_p11, %p907_p8 }
 0x204   :  { %570 = vrot.lane.b32.xlu1 %v1301_v12, %s938_s22  ;;  %568 = vrot.lane.b32.xlu0 %v1285_v6, %s938_s22 }
 0x208   :  { %727 = vrot.lane.b32.xlu1 %v1457_v11, %s939_s23  ;;  %725 = vrot.lane.b32.xlu0 %v1459_v34, %s939_s23 }
 0x20c   :  { %733 = vrot.lane.b32.xlu1 %v1457_v11, %s940_s24  ;;  %731 = vrot.lane.b32.xlu0 %v1459_v34, %s940_s24 }
 0x20e   :  { %v518_v4 = vpop.permute.xlu1 %517  ;;  %v516_v5 = vpop.permute.xlu0 %515 }
 0x20f   :  { %v523_v13 = vsel %vm521_vm11, %v1430_v20, %v518_v4  ;;  %v522_v35 = vsel %vm521_vm11, %v1433_v21, %v516_v5  ;;  %vm1719_vm11 = vmmov %vm1718_vm2 }
 0x210   :  { %525 = vst [vmem:[#allocation5 + $0x38] sm:$0xff] %v523_v13  ;;  %524 = vst [vmem:[#allocation5 + $0x10] sm:$0xff] %v522_v35  ;;  %576 = vrot.lane.b32.xlu1 %v1301_v12, %s940_s24  ;;  %574 = vrot.lane.b32.xlu0 %v1285_v6, %s940_s24 }
 0x212   :  { %v614_v15 = vpop.permute.xlu1 %613  ;;  %v612_v37 = vpop.permute.xlu0 %611 }
 0x216   :  { %v620_v16 = vpop.permute.xlu1 %619  ;;  %v618_v17 = vpop.permute.xlu0 %617 }
 0x217   :  { %v664_v18 = vsel %vm68_vm1, %v614_v15, %v620_v16  ;;  %v663_v19 = vsel %vm68_vm1, %v612_v37, %v618_v17 }
 0x21a   :  { %v771_v38 = vpop.permute.xlu1 %770  ;;  %v769_v39 = vpop.permute.xlu0 %768 }
 0x21e   :  { %v777_v1 = vpop.permute.xlu1 %776  ;;  %v775_v40 = vpop.permute.xlu0 %774 }
 0x21f   :  { %v811_v51 = vsel %vm234_vm6, %v771_v38, %v777_v1  ;;  %v810_v52 = vsel %vm234_vm6, %v769_v39, %v775_v40 }
 0x222   :  { %v626_v0 = vpop.permute.xlu1 %625  ;;  %v624_v9 = vpop.permute.xlu0 %623 }
 0x223   :  { %v666_v22 = vsel %vm1716_vm13, %v664_v18, %v626_v0  ;;  %v665_v23 = vsel %vm1717_vm15, %v663_v19, %v624_v9 }
 0x226   :  { %v783_v7 = vpop.permute.xlu1 %782  ;;  %v781_v41 = vpop.permute.xlu0 %780 }
 0x227   :  { %v813_v55 = vsel %vm68_vm1, %v811_v51, %v783_v7  ;;  %v812_v2 = vsel %vm68_vm1, %v810_v52, %v781_v41 }
 0x22a   :  { %v632_v42 = vpop.permute.xlu1 %631  ;;  %v630_v43 = vpop.permute.xlu0 %629 }
 0x22b   :  { %v668_v26 = vsel %vm74_vm3, %v666_v22, %v632_v42  ;;  %v667_v48 = vsel %vm74_vm3, %v665_v23, %v630_v43 }
 0x22e   :  { %v789_v46 = vpop.permute.xlu1 %788  ;;  %v787_v58 = vpop.permute.xlu0 %786 }
 0x22f   :  { %v815_v45 = vsel %vm1717_vm15, %v813_v55, %v789_v46  ;;  %v814_v27 = vsel %vm1722_vm7, %v812_v2, %v787_v58  ;;  %vm1724_vm7 = vcmask 15360  }
 0x232   :  { %v638_v47 = vpop.permute.xlu1 %637  ;;  %v636_v59 = vpop.permute.xlu0 %635 }
 0x233   :  { %v670_v49 = vsel %vm246_vm4, %v668_v26, %v638_v47  ;;  %v669_v50 = vsel %vm246_vm4, %v667_v48, %v636_v59 }
 0x236   :  { %v648_v60 = vpop.permute.xlu1 %647  ;;  %v646_v36 = vpop.permute.xlu0 %645 }
 0x237   :  { %v653_v24 = vsel %vm83_vm5, %v646_v36, %v648_v60 }
 0x238   :  { %v671_v53 = vsel %vm1719_vm11, %v669_v50, %v653_v24  ;;  %vm1723_vm11 = vmmov %vm1718_vm2 }
 0x23a   :  { %v652_v61 = vpop.permute.xlu1 %651  ;;  %v650_v62 = vpop.permute.xlu0 %649 }
 0x23b   :  { %v654_v25 = vsel %vm83_vm5, %v650_v62, %v652_v61  ;;  %vm1720_vm5 = vcmask 293888  }
 0x23c   :  { %v672_v29 = vsel %vm1718_vm2, %v670_v49, %v654_v25  ;;  %vm1721_vm13 = vmmov %vm1720_vm5 }
 0x23e   :  { %v795_v14 = vpop.permute.xlu1 %794  ;;  %v793_v63 = vpop.permute.xlu0 %792 }
 0x23f   :  { %v817_v56 = vsel %vm74_vm3, %v815_v45, %v795_v14  ;;  %v816_v57 = vsel %vm74_vm3, %v814_v27, %v793_v63 }
 0x242   :  { %v801_v20 = vpop.permute.xlu1 %800  ;;  %v799_v21 = vpop.permute.xlu0 %798 }
 0x243   :  { %v819_v30 = vsel %vm246_vm4, %v817_v56, %v801_v20  ;;  %v818_v8 = vsel %vm246_vm4, %v816_v57, %v799_v21 }
 0x246   :  { %v660_v28 = vpop.permute.xlu1 %659  ;;  %v658_v54 = vpop.permute.xlu0 %657 }
 0x247   :  { %v674_v3 = vsel %vm1720_vm5, %v672_v29, %v660_v28  ;;  %v673_v44 = vsel %vm1721_vm13, %v671_v53, %v658_v54  ;;  %vm1725_vm5 = vmmov %vm1724_vm7 }
 0x248   :  { %679 = vrot.lane.b32.xlu1 %v674_v3, %s952_s7  ;;  %677 = vrot.lane.b32.xlu0 %v673_v44, %s952_s7 }
 0x24a   :  { %v807_v31 = vpop.permute.xlu1 %806  ;;  %v805_v32 = vpop.permute.xlu0 %804 }
 0x24b   :  { %v821_v33 = vsel %vm1718_vm2, %v819_v30, %v807_v31  ;;  %v820_v10 = vsel %vm1723_vm11, %v818_v8, %v805_v32  ;;  %vm1732_vm11 = vcmask 293888  }
 0x24c   :  { %826 = vrot.lane.b32.xlu1 %v821_v33, %s962_s19  ;;  %824 = vrot.lane.b32.xlu0 %v820_v10, %s962_s19 }
 0x24e   :  { %v1597_v4 = vpop.permute.xlu1 %538  ;;  %v1599_v5 = vpop.permute.xlu0 %536 }
 0x252   :  { %v547_v13 = vpop.permute.xlu1 %546  ;;  %v545_v35 = vpop.permute.xlu0 %544 }
 0x253   :  { %v581_v47 = vsel %vm234_vm6, %v1597_v4, %v547_v13  ;;  %v580_v59 = vsel %vm234_vm6, %v1599_v5, %v545_v35  ;;  %vm1726_vm6 = vcmask 97280  }
 0x254   :  { %v583_v61 = vsel %vm68_vm1, %v581_v47, %v1301_v12  ;;  %v582_v62 = vsel %vm68_vm1, %v580_v59, %v1285_v6  ;;  %vm1727_vm13 = vmmov %vm1726_vm6 }
 0x255   :  { %vm1728_vm1 = vmmov %vm1718_vm2 }
 0x256   :  { %v696_v15 = vpop.permute.xlu1 %695  ;;  %v694_v37 = vpop.permute.xlu0 %693  ;;  %vm1729_vm15 = vmmov %vm1728_vm1 }
 0x257   :  { %v738_v14 = vsel %vm1724_vm7, %v696_v15, %v1457_v11  ;;  %v737_v63 = vsel %vm1725_vm5, %v694_v37, %v1459_v34  ;;  %vm1733_vm7 = vmmov %vm1732_vm11  ;;  %vm1736_vm5 = vcmask 375808  }
 0x25a   :  { %v704_v16 = vpop.permute.xlu1 %703  ;;  %v702_v17 = vpop.permute.xlu0 %701 }
 0x25b   :  { %v740_v22 = vsel %vm1726_vm6, %v738_v14, %v704_v16  ;;  %v739_v23 = vsel %vm1727_vm13, %v737_v63, %v702_v17  ;;  %vm1737_vm6 = vmmov %vm1736_vm5 }
 0x25e   :  { %v553_v38 = vpop.permute.xlu1 %552  ;;  %v551_v39 = vpop.permute.xlu0 %550 }
 0x25f   :  { %v585_v18 = vsel %vm74_vm3, %v583_v61, %v553_v38  ;;  %v584_v19 = vsel %vm74_vm3, %v582_v62, %v551_v39  ;;  %vm1730_vm3 = vcmask 179200  }
 0x260   :  { %vm1731_vm2 = vmmov %vm1730_vm3 }
 0x262   :  { %v710_v1 = vpop.permute.xlu1 %709  ;;  %v708_v40 = vpop.permute.xlu0 %707 }
 0x263   :  { %v742_v26 = vsel %vm419_vm8, %v740_v22, %v710_v1  ;;  %v741_v48 = vsel %vm419_vm8, %v739_v23, %v708_v40  ;;  %vm1734_vm8 = vcmask 326656  }
 0x266   :  { %v559_v0 = vpop.permute.xlu1 %558  ;;  %v557_v9 = vpop.permute.xlu0 %556 }
 0x267   :  { %v587_v24 = vsel %vm246_vm4, %v585_v18, %v559_v0  ;;  %v586_v25 = vsel %vm246_vm4, %v584_v19, %v557_v9  ;;  %vm1735_vm4 = vmmov %vm1734_vm8 }
 0x26a   :  { %v716_v7 = vpop.permute.xlu1 %715  ;;  %v714_v41 = vpop.permute.xlu0 %713 }
 0x26b   :  { %v744_v28 = vsel %vm1730_vm3, %v742_v26, %v716_v7  ;;  %v743_v29 = vsel %vm1731_vm2, %v741_v48, %v714_v41  ;;  %vm1744_vm2 = vcmask 424960  }
 0x26e   :  { %v565_v42 = vpop.permute.xlu1 %564  ;;  %v563_v43 = vpop.permute.xlu0 %562 }
 0x26f   :  { %v589_v49 = vsel %vm1728_vm1, %v587_v24, %v565_v42  ;;  %v588_v50 = vsel %vm1729_vm15, %v586_v25, %v563_v43  ;;  %vm1740_vm1 = vcmask 343040  }
 0x270   :  { %vm1741_vm15 = vmmov %vm1740_vm1 }
 0x272   :  { %v722_v46 = vpop.permute.xlu1 %721  ;;  %v720_v58 = vpop.permute.xlu0 %719 }
 0x273   :  { %v746_v55 = vsel %vm422_vm14, %v744_v28, %v722_v46  ;;  %v745_v2 = vsel %vm422_vm14, %v743_v29, %v720_v58  ;;  %vm1738_vm14 = vcmask 408576  }
 0x274   :  { %vm1739_vm13 = vmmov %vm1738_vm14 }
 0x276   :  { %v571_v60 = vpop.permute.xlu1 %570  ;;  %v569_v36 = vpop.permute.xlu0 %568 }
 0x277   :  { %v591_v53 = vsel %vm1732_vm11, %v589_v49, %v571_v60  ;;  %v590_v54 = vsel %vm1733_vm7, %v588_v50, %v569_v36  ;;  %vm1745_vm11 = vmmov %vm1744_vm2 }
 0x278   :  { %v593_v3 = vsel %vm1734_vm8, %v591_v53, %v1597_v4  ;;  %v592_v45 = vsel %vm1735_vm4, %v590_v54, %v1599_v5  ;;  %vm1748_vm8 = vcmask 506880  }
 0x279   :  { %vm1749_vm4 = vmmov %vm1748_vm8 }
 0x27a   :  { %v728_v20 = vpop.permute.xlu1 %727  ;;  %v726_v21 = vpop.permute.xlu0 %725 }
 0x27b   :  { %v748_v56 = vsel %vm490_vm12, %v746_v55, %v728_v20  ;;  %v747_v57 = vsel %vm490_vm12, %v745_v2, %v726_v21  ;;  %vm1742_vm12 = vcmask 490496  }
 0x27c   :  { %vm1743_vm3 = vmmov %vm1742_vm12 }
 0x27e   :  { %v734_v51 = vpop.permute.xlu1 %733  ;;  %v732_v52 = vpop.permute.xlu0 %731 }
 0x27f   :  { %v750_v31 = vsel %vm427_vm0, %v748_v56, %v734_v51  ;;  %v749_v32 = vsel %vm427_vm0, %v747_v57, %v732_v52  ;;  %vm1746_vm0 = vcmask 572416  }
 0x280   :  { %v752_v13 = vsel %vm1740_vm1, %v750_v31, %v1457_v11  ;;  %v751_v35 = vsel %vm1741_vm15, %v749_v32, %v1459_v34  ;;  %vm1747_vm7 = vmmov %vm1746_vm0  ;;  %vm1752_vm1 = vcmask 556032  }
 0x281   :  { %v754_v47 = vsel %vm1744_vm2, %v752_v13, %v704_v16  ;;  %v753_v59 = vsel %vm1745_vm11, %v751_v35, %v702_v17  ;;  %vm1758_vm2 = vcmask 736256  }
 0x282   :  { %v577_v44 = vpop.permute.xlu1 %576  ;;  %v575_v27 = vpop.permute.xlu0 %574  ;;  %v755_v62 = vsel %vm437_vm10, %v753_v59, %v708_v40  ;;  %vm1759_vm11 = vmmov %vm1758_vm2 }
 0x283   :  { %v595_v30 = vsel %vm1736_vm5, %v593_v3, %v577_v44  ;;  %v594_v8 = vsel %vm1737_vm6, %v592_v45, %v575_v27  ;;  %vm606_vm5 = vcmask 654336   ;;  %vm1750_vm6 = vcmask 621568  }
 0x284   :  { %v597_v33 = vsel %vm1738_vm14, %v595_v30, %v1301_v12  ;;  %v596_v10 = vsel %vm1739_vm13, %v594_v8, %v1285_v6  ;;  %v756_v6 = vsel %vm437_vm10, %v754_v47, %v710_v1  ;;  %vm1751_vm14 = vmmov %vm1750_vm6  ;;  %vm761_vm13 = vcmask 588800  }
 0x285   :  { %v599_v15 = vsel %vm1742_vm12, %v597_v33, %v553_v38  ;;  %v598_v37 = vsel %vm1743_vm3, %v596_v10, %v551_v39  ;;  %v758_v38 = vsel %vm1748_vm8, %v756_v6, %v716_v7  ;;  %v757_v39 = vsel %vm1749_vm4, %v755_v62, %v714_v41 }
 0x286   :  { %v601_v61 = vsel %vm267_vm9, %v599_v15, %v559_v0  ;;  %v600_v12 = vsel %vm267_vm9, %v598_v37, %v557_v9  ;;  %v760_v0 = vsel %vm1752_vm1, %v758_v38, %v722_v46  ;;  %vm1753_vm9 = vmmov %vm1752_vm1  ;;  %vm1754_vm10 = vcmask 703488  }
 0x287   :  { %v603_v14 = vsel %vm1746_vm0, %v601_v61, %v565_v42  ;;  %v602_v63 = vsel %vm1747_vm7, %v600_v12, %v563_v43  ;;  %v759_v1 = vsel %vm1753_vm9, %v757_v39, %v720_v58  ;;  %v763_v42 = vsel %vm761_vm13, %v760_v0, %v728_v20  ;;  %vm1755_vm15 = vmmov %vm1754_vm10 }
 0x288   :  { %v605_v16 = vsel %vm1750_vm6, %v603_v14, %v571_v60  ;;  %v604_v17 = vsel %vm1751_vm14, %v602_v63, %v569_v36  ;;  %v762_v43 = vsel %vm761_vm13, %v759_v1, %v726_v21  ;;  %vm1756_vm12 = vcmask 637952  }
 0x289   :  { %v608_v40 = vsel %vm606_vm5, %v605_v16, %v1597_v4  ;;  %v607_v9 = vsel %vm606_vm5, %v604_v17, %v1599_v5  ;;  %v765_v60 = vsel %vm1756_vm12, %v763_v42, %v734_v51  ;;  %vm1757_vm3 = vmmov %vm1756_vm12  ;;  %vm830_vm0 = vcmask 752640  }
 0x28a   :  { %v610_v7 = vsel %vm1754_vm10, %v608_v40, %v577_v44  ;;  %v609_v41 = vsel %vm1755_vm15, %v607_v9, %v575_v27  ;;  %v764_v36 = vsel %vm1757_vm3, %v762_v43, %v732_v52  ;;  %vm1760_vm7 = vcmask 670720  }
 0x28b   :  { %v767_v4 = vsel %vm1760_vm7, %v765_v60, %v1457_v11  ;;  %vm1761_vm8 = vmmov %vm1760_vm7 }
 0x28c   :  { %v766_v20 = vsel %vm1761_vm8, %v764_v36, %v1459_v34 }
 0x2ba   :  { %v680_v18 = vpop.permute.xlu1 %679  ;;  %v678_v19 = vpop.permute.xlu0 %677 }
 0x2bb   :  { %v684_v46 = vsel %vm1758_vm2, %v610_v7, %v680_v18  ;;  %v683_v58 = vsel %vm1759_vm11, %v609_v41, %v678_v19 }
 0x2bc   :  { %686 = vst [vmem:[#allocation5 + $0x40] sm:$0xff] %v684_v46  ;;  %685 = vst [vmem:[#allocation5 + $0x18] sm:$0xff] %v683_v58 }
 0x2be   :  { %v827_v5 = vpop.permute.xlu1 %826  ;;  %v825_v21 = vpop.permute.xlu0 %824 }
 0x2bf   :  { %v832_v22 = vsel %vm830_vm0, %v767_v4, %v827_v5  ;;  %v831_v23 = vsel %vm830_vm0, %v766_v20, %v825_v21 }
 0x2c0   :  { %834 = vst [vmem:[#allocation5 + $0x48] sm:$0xff] %v832_v22  ;;  %833 = vst [vmem:[#allocation5 + $0x20] sm:$0xff] %v831_v23 }
 0x2c1   :  { %917 = shalt.err (!%p914_p12)
}
 0x2c2   :  { %s918_s24 = scalar_lea.hbm %s1691_s1, 1280 }
 0x2c3   :  { %p919_p13 = scmp.ne.s32.totalorder %s1691_s1, %s918_s24  ;;  %p922_p0 = scmp.lt.u32.totalorder %s918_s24, %s1691_s1 }
 0x2c5   :  { %p924_p1 = pnand %p922_p0, %p919_p13 }
 0x2c7   :  { %927 = shalt.err (!%p924_p1)
}
 0x2c8   :  { %846 = dma.vmem_to_hbm [thread:$0]  %s841_s21, 1280, %s1691_s1, [#allocation4], %s933_s16, %s933_s16, %s934_s17  }
 0x2c9   :  { %930 = dma.done.wait [#allocation4], 1280  }
 0x2ca   :  { %931 = vsyncadd [#allocation4], 4294966016 }
 0x2cb   :  { %850 = vsyncpa [#allocation3], 1 }
 0x2cc   :  { %851 = vsyncpa [#allocation4], 1 }

</bundles_post_ra>
